<compile_context>
chip_gen: v7x
topology: tpu7x:2x2x1
jax: 0.10.0
libtpu: 0.0.40
codegen_flags: <defaults>
</compile_context>

<pallas_src>
import functools

import jax
import jax.numpy as jnp
from jax.experimental import pallas as pl
from jax.experimental.pallas import tpu as pltpu


# ----------------------------------------------------------------------------
# Hardware detection (Python/trace time only — never in the hot loop).
# ----------------------------------------------------------------------------
def _round_up(x, m):
    return ((x + m - 1) // m) * m


def _tpu_generation_and_vmem():
    """Best-effort (generation, per-core VMEM bytes) with conservative fallback."""
    vmem_cap = None
    try:
        vmem_cap = int(pltpu.get_tpu_info().vmem_capacity_bytes)
    except Exception:
        vmem_cap = None
    gen = "unknown"
    try:
        kind = jax.devices()[0].device_kind.lower()
        if "v5" in kind:
            gen = "v5e"
        elif "v6" in kind:
            gen = "v6e"
        elif "v7" in kind or "7x" in kind:
            gen = "v7x"
    except Exception:
        pass
    if vmem_cap is None:
        # Conservative: assume the smallest (v7x-like) VMEM if we cannot query.
        vmem_cap = (128 << 20) if gen in ("v5e", "v6e") else (64 << 20)
    return gen, vmem_cap


def _vmem_working_set_bytes(tm, tn, H, act_dtype, w_dtype,
                            single_buffer_io=True, weight_buffers=2):
    """Estimate of the kernel's VMEM working set, incl. in-kernel f32 temps."""
    xb = jnp.dtype(act_dtype).itemsize
    wb = jnp.dtype(w_dtype).itemsize
    io = 1 if single_buffer_io else 2
    return int(
        io * tm * H * xb                          # x tile(s)
        + io * tm * H * xb                        # output tile(s)
        + weight_buffers * H * (2 * tn) * wb      # merged gate|up weight tiles
        + weight_buffers * tn * H * wb            # down-proj weight tiles
        + tm * H * 4                              # f32 accumulator scratch
        + tm * (2 * tn) * 4                       # gu f32 MXU result
        + tm * tn * (4 + wb)                      # h in f32 + cast for down-proj
        + (2 << 20)                               # compiler-internal scratch headroom
    )


def _pick_tn(intermediate_size, preferred):
    """Largest lane-friendly tile of the intermediate axis that divides it."""
    candidates = [preferred] + [t for t in (512, 384, 256, 128, 64)
                                if t != preferred]
    for tn in candidates:
        if tn <= intermediate_size and intermediate_size % tn == 0 and tn % 8 == 0:
            return tn
    if intermediate_size % 8 == 0:
        return intermediate_size        # single intermediate tile
    raise ValueError(
        f"intermediate_size={intermediate_size} has no sublane-friendly tile")


def _choose_tm(num_tokens, H, tn, act_dtype, w_dtype):
    gen, vmem_cap = _tpu_generation_and_vmem()
    # Arithmetic intensity is ~tm flop per weight byte:
    #   v6e needs ~714 flop/B -> tm up to 1024 for prefill (plenty of 128 MiB VMEM)
    #   v7x needs ~310 flop/B -> tm=512 (fits 64 MiB VMEM with tn=256)
    #   v5e is already compute-bound at tm=256; bigger just burns VMEM.
    tm_cap = {"v6e": 1024, "v7x": 512, "v5e": 256}.get(gen, 512)
    tm = max(8, min(tm_cap, _round_up(num_tokens, 8)))
    # Shrink until the working set fits comfortably in physical VMEM.
    while tm > 64 and _vmem_working_set_bytes(
            tm, tn, H, act_dtype, w_dtype) > 0.8 * vmem_cap:
        tm = max(64, _round_up(tm // 2, 8))
    return tm


def choose_tiles(num_tokens, hidden_size, intermediate_size,
                 act_dtype=jnp.bfloat16, w_dtype=jnp.bfloat16):
    """Generation-aware (tm, tn) for this chip / problem size."""
    gen, _ = _tpu_generation_and_vmem()
    tn_pref = 256 if gen in ("v7x", "unknown") else 512
    tn = _pick_tn(intermediate_size, tn_pref)
    tm = _choose_tm(num_tokens, hidden_size, tn, act_dtype, w_dtype)
    return tm, tn


# ----------------------------------------------------------------------------
# Kernel
# ----------------------------------------------------------------------------
def _llama_mlp_kernel(x_ref, wgu_ref, wd_ref, o_ref, acc_ref, *, tn):
    """Grid point (i, j): token tile i, intermediate tile j.

    out[i] += (silu(x[i] @ Wg[:, j]) * (x[i] @ Wu[:, j])) @ Wd[j, :]
    """
    j = pl.program_id(1)

    @pl.when(j == 0)
    def _():
        acc_ref[...] = jnp.zeros_like(acc_ref)

    x = x_ref[...]                                                      # [tm, H]
    # Fused gate+up projection: one wide MXU matmul, N = 2*tn, f32 accumulate.
    gu = jnp.dot(x, wgu_ref[...], preferred_element_type=jnp.float32)   # [tm, 2*tn]
    gate = gu[:, :tn]
    up = gu[:, tn:]
    # SiluAndMul epilogue (EUP sigmoid + VPU multiplies) in f32.
    # TODO(synk): optional bf16 epilogue on v6e/v7x (bf16 VPU/EUP) for ~3-5%.
    h = (gate * jax.nn.sigmoid(gate)) * up                              # [tm, tn]
    # Partial down projection, accumulated in the f32 VMEM scratch.
    acc_ref[...] += jnp.dot(h.astype(wd_ref.dtype), wd_ref[...],
                            preferred_element_type=jnp.float32)         # [tm, H]

    @pl.when(j == pl.num_programs(1) - 1)
    def _():
        o_ref[...] = acc_ref[...].astype(o_ref.dtype)


# ----------------------------------------------------------------------------
# Weight repack (model-load time; NOT in the hot path).
# ----------------------------------------------------------------------------
def prepare_llama_mlp_weights(w_gate_up, w_down, *, tn):
    """Repack torch-layout weights for the streamed kernel.

    w_gate_up: [2*I, H]  (rows [:I] = gate, rows [I:] = up; nn.Linear layout)
    w_down   : [H, I]
    Returns
      w_gu: [I//tn, H, 2*tn]  tile j = [gate[:, j*tn:(j+1)*tn] | up[:, same]]
      w_d : [I, H]
    """
    two_i, H = w_gate_up.shape
    I = two_i // 2
    assert I % tn == 0, f"intermediate size {I} must be divisible by tn={tn}"
    nj = I // tn
    wg = jnp.asarray(w_gate_up)[:I, :].T                      # [H, I]
    wu = jnp.asarray(w_gate_up)[I:, :].T                      # [H, I]
    wg_t = wg.reshape(H, nj, tn).transpose(1, 0, 2)           # [nj, H, tn]
    wu_t = wu.reshape(H, nj, tn).transpose(1, 0, 2)           # [nj, H, tn]
    w_gu = jnp.concatenate([wg_t, wu_t], axis=-1)             # [nj, H, 2*tn]
    w_d = jnp.asarray(w_down).T                               # [I, H]
    return w_gu, w_d


# ----------------------------------------------------------------------------
# pallas_call wrapper
# ----------------------------------------------------------------------------
@functools.partial(jax.jit, static_argnames=("tm", "single_buffer_io"))
def _llama_mlp_call(x, w_gu, w_d, *, tm, single_buffer_io):
    T, H = x.shape
    nj, H2, two_tn = w_gu.shape
    tn = two_tn // 2
    I, H3 = w_d.shape
    assert H2 == H and H3 == H and I == nj * tn

    n_tt = pl.cdiv(T, tm)           # ragged last tile handled by boundary blocks

    xb = jnp.dtype(x.dtype).itemsize
    wb = jnp.dtype(w_gu.dtype).itemsize

    # Advisory cost estimate so XLA schedules surrounding ops sensibly.
    cost = pl.CostEstimate(
        flops=6 * T * H * I,
        transcendentals=T * I,
        bytes_accessed=(2 * T * H * xb              # activations in + out
                        + n_tt * 3 * H * I * wb),   # streamed weights
    )

    # Generation-aware VMEM limit: never exceed ~85% of the *physical* VMEM.
    _, vmem_cap = _tpu_generation_and_vmem()
    ws = _vmem_working_set_bytes(tm, tn, H, x.dtype, w_gu.dtype,
                                 single_buffer_io=single_buffer_io)
    hard_cap = int(0.85 * vmem_cap)
    vmem_limit = min(int(ws * 1.25) + (2 << 20), hard_cap)
    vmem_limit = max(vmem_limit, min(32 << 20, hard_cap))

    # x / output block indices are constant along j -> single-buffer them to
    # free VMEM for larger tiles (only one exposed DMA every nj steps).
    io_mode = dict(pipeline_mode=pl.Buffered(1)) if single_buffer_io else {}

    grid_spec = pltpu.PrefetchScalarGridSpec(
        num_scalar_prefetch=0,
        grid=(n_tt, nj),
        in_specs=[
            # x tile: resident across the inner (reduction) axis.
            pl.BlockSpec((tm, H), lambda i, j: (i, 0), **io_mode),
            # merged gate|up weight tile [H, 2*tn], streamed over j.
            pl.BlockSpec((None, H, 2 * tn), lambda i, j: (j, 0, 0)),
            # down-proj weight tile [tn, H], streamed over j.
            pl.BlockSpec((tn, H), lambda i, j: (j, 0)),
        ],
        out_specs=pl.BlockSpec((tm, H), lambda i, j: (i, 0), **io_mode),
        scratch_shapes=[pltpu.VMEM((tm, H), jnp.float32)],
    )

    return pl.pallas_call(
        functools.partial(_llama_mlp_kernel, tn=tn),
        out_shape=jax.ShapeDtypeStruct((T, H), x.dtype),
        grid_spec=grid_spec,
        compiler_params=pltpu.CompilerParams(
            dimension_semantics=("parallel", "arbitrary"),
            vmem_limit_bytes=vmem_limit,
        ),
        cost_estimate=cost,
    )(x, w_gu, w_d)


def llama_mlp(x, w_gu, w_d, *, tm=None):
    """Fused LlamaMLP forward.

    x   : [T, H]
    w_gu: [I//tn, H, 2*tn]   (pre-packed, see prepare_llama_mlp_weights)
    w_d : [I, H]
    """
    T, H = x.shape
    _, _, two_tn = w_gu.shape
    tn = two_tn // 2
    if tm is None:
        tm = _choose_tm(T, H, tn, x.dtype, w_gu.dtype)
    tm = max(8, min(_round_up(tm, 8), _round_up(T, 8)))
    try:
        return _llama_mlp_call(x, w_gu, w_d, tm=tm, single_buffer_io=True)
    except Exception:
        # Fallback for Pallas versions without BlockSpec(pipeline_mode=...):
        # default double-buffered I/O tiles, identical math.
        return _llama_mlp_call(x, w_gu, w_d, tm=tm, single_buffer_io=False)


# ----------------------------------------------------------------------------
# Pure-JAX reference (mirrors the PyTorch module semantics)
# ----------------------------------------------------------------------------
def _reference_mlp(x, w_gate_up, w_down):
    x = x.astype(jnp.float32)
    w_gate_up = w_gate_up.astype(jnp.float32)
    w_down = w_down.astype(jnp.float32)
    gate_up = x @ w_gate_up.T                      # [T, 2*I]
    I = gate_up.shape[-1] // 2
    gate, up = gate_up[:, :I], gate_up[:, I:]
    h = jax.nn.silu(gate) * up                     # SiluAndMul
    return h @ w_down.T                            # [T, H]


if __name__ == "__main__":
    # Small but tile-friendly shapes.  T is deliberately NOT a multiple of the
    # token tile so the ragged boundary-block path is exercised (no padding).
    num_tokens = 200
    hidden_size = 256
    intermediate_size = 512

    key = jax.random.PRNGKey(0)
    kx, kgu, kd = jax.random.split(key, 3)

    x_f32 = jax.random.normal(kx, (num_tokens, hidden_size), dtype=jnp.float32)
    # torch nn.Linear layout: [out_features, in_features], bias=False.
    w_gate_up_f32 = jax.random.normal(
        kgu, (2 * intermediate_size, hidden_size), dtype=jnp.float32) * 0.02
    w_down_f32 = jax.random.normal(
        kd, (hidden_size, intermediate_size), dtype=jnp.float32) * 0.02

    # --- f32 path with explicit small tiles: exercises multi-tile accumulation
    #     over j AND the ragged final token tile. ---
    tm_small, tn_small = 64, 128
    w_gu32, w_d32 = prepare_llama_mlp_weights(w_gate_up_f32, w_down_f32,
                                              tn=tn_small)
    out32 = jax.block_until_ready(llama_mlp(x_f32, w_gu32, w_d32, tm=tm_small))
    ref32 = _reference_mlp(x_f32, w_gate_up_f32, w_down_f32)
    assert out32.shape == (num_tokens, hidden_size)
    assert jnp.allclose(out32, ref32, atol=1e-4, rtol=1e-4), (
        float(jnp.max(jnp.abs(out32 - ref32))))

    # --- bf16 hot path with auto (generation-aware) tiles. ---
    x_bf = x_f32.astype(jnp.bfloat16)
    auto_tm, auto_tn = choose_tiles(num_tokens, hidden_size, intermediate_size,
                                    jnp.bfloat16, jnp.bfloat16)
    w_gu_bf, w_d_bf = prepare_llama_mlp_weights(
        w_gate_up_f32.astype(jnp.bfloat16),
        w_down_f32.astype(jnp.bfloat16), tn=auto_tn)
    out_bf = jax.block_until_ready(llama_mlp(x_bf, w_gu_bf, w_d_bf, tm=auto_tm))
    ref_bf = _reference_mlp(x_bf, w_gate_up_f32.astype(jnp.bfloat16),
                            w_down_f32.astype(jnp.bfloat16))
    assert out_bf.shape == (num_tokens, hidden_size)
    assert jnp.allclose(out_bf.astype(jnp.float32), ref_bf, atol=5e-3, rtol=5e-2)

    print("KERNEL_OK")
</pallas_src>

<mosaic_0001>
module attributes {stable_mosaic.version = 11 : i64} {
  func.func @_llama_mlp_kernel(%arg0: i32, %arg1: i32, %arg2: memref<64x256xf32, #tpu.memory_space<vmem>>, %arg3: memref<1x256x256xf32, #tpu.memory_space<vmem>>, %arg4: memref<128x256xf32, #tpu.memory_space<vmem>>, %arg5: memref<64x256xf32, #tpu.memory_space<vmem>>, %arg6: memref<64x256xf32, #tpu.memory_space<vmem>>) attributes {dimension_semantics = [#tpu.dimension_semantics<parallel>, #tpu.dimension_semantics<arbitrary>], iteration_bounds = array<i64: 4, 4>, scalar_prefetch = 0 : i64, scratch_operands = 1 : i64, tpu.core_type = #tpu.core_type<tc>, window_params = [{pipeline_mode = #tpu.pipeline_mode<synchronous>, transform_indices = @transform_0, window_bounds = array<i64: 64, 256>}, {transform_indices = @transform_1, window_bounds = array<i64: 1, 256, 256>}, {transform_indices = @transform_2, window_bounds = array<i64: 128, 256>}, {pipeline_mode = #tpu.pipeline_mode<synchronous>, transform_indices = @transform_3, window_bounds = array<i64: 64, 256>}]} {
    %c0_i32 = arith.constant 0 : i32
    %0 = arith.cmpi eq, %arg1, %c0_i32 : i32
    %1 = arith.extui %0 : i1 to i32
    %c0_i32_0 = arith.constant 0 : i32
    %2 = arith.cmpi ne, %1, %c0_i32_0 : i32
    scf.if %2 {
      %cst_14 = arith.constant 0.000000e+00 : f32
      %24 = vector.broadcast %cst_14 : f32 to vector<64x256xf32>
      %c0_15 = arith.constant 0 : index
      %c0_16 = arith.constant 0 : index
      %25 = vector.load %arg6[%c0_15, %c0_16] : memref<64x256xf32, #tpu.memory_space<vmem>>, vector<64x256xf32>
      tpu.vector_store %arg6[%c0_15, %c0_16], %24 {strides = array<i32>} : memref<64x256xf32, #tpu.memory_space<vmem>>, vector<64x256xf32>,
    } else {
    }
    %c0 = arith.constant 0 : index
    %c0_1 = arith.constant 0 : index
    %3 = vector.load %arg2[%c0, %c0_1] : memref<64x256xf32, #tpu.memory_space<vmem>>, vector<64x256xf32>
    %c0_2 = arith.constant 0 : index
    %c0_3 = arith.constant 0 : index
    %c0_4 = arith.constant 0 : index
    %4 = vector.load %arg3[%c0_2, %c0_3, %c0_4] : memref<1x256x256xf32, #tpu.memory_space<vmem>>, vector<1x256x256xf32>
    %5 = vector.shape_cast %4 : vector<1x256x256xf32> to vector<256x256xf32>
    %cst = arith.constant dense<0.000000e+00> : vector<64x256xf32>
    %6 = tpu.matmul %3, %5, %cst {dimension_numbers = #tpu.dot_dimension_numbers<[1], [0], [0], [1], [0, 0, 1, 1], [], []>} : vector<64x256xf32>, vector<256x256xf32>, vector<64x256xf32> -> vector<64x256xf32>
    %7 = vector.extract_strided_slice %6 {offsets = [0, 0], sizes = [64, 128], strides = [1, 1]} : vector<64x256xf32> to vector<64x128xf32>
    %8 = vector.extract_strided_slice %6 {offsets = [0, 128], sizes = [64, 128], strides = [1, 1]} : vector<64x256xf32> to vector<64x128xf32>
    %9 = arith.negf %7 : vector<64x128xf32>
    %10 = math.exp %9 : vector<64x128xf32>
    %cst_5 = arith.constant 1.000000e+00 : f32
    %11 = vector.broadcast %cst_5 : f32 to vector<64x128xf32>
    %12 = arith.addf %11, %10 : vector<64x128xf32>
    %13 = arith.divf %11, %12 : vector<64x128xf32>
    %14 = arith.mulf %7, %13 : vector<64x128xf32>
    %15 = arith.mulf %14, %8 : vector<64x128xf32>
    %c0_6 = arith.constant 0 : index
    %c0_7 = arith.constant 0 : index
    %16 = vector.load %arg6[%c0_6, %c0_7] : memref<64x256xf32, #tpu.memory_space<vmem>>, vector<64x256xf32>
    %c0_8 = arith.constant 0 : index
    %c0_9 = arith.constant 0 : index
    %17 = vector.load %arg4[%c0_8, %c0_9] : memref<128x256xf32, #tpu.memory_space<vmem>>, vector<128x256xf32>
    %cst_10 = arith.constant dense<0.000000e+00> : vector<64x256xf32>
    %18 = tpu.matmul %15, %17, %cst_10 {dimension_numbers = #tpu.dot_dimension_numbers<[1], [0], [0], [1], [0, 0, 1, 1], [], []>} : vector<64x128xf32>, vector<128x256xf32>, vector<64x256xf32> -> vector<64x256xf32>
    %19 = arith.addf %16, %18 : vector<64x256xf32>
    %c0_11 = arith.constant 0 : index
    %c0_12 = arith.constant 0 : index
    %20 = vector.load %arg6[%c0_11, %c0_12] : memref<64x256xf32, #tpu.memory_space<vmem>>, vector<64x256xf32>
    tpu.vector_store %arg6[%c0_11, %c0_12], %19 {strides = array<i32>} : memref<64x256xf32, #tpu.memory_space<vmem>>, vector<64x256xf32>,
    %c3_i32 = arith.constant 3 : i32
    %21 = arith.cmpi eq, %arg1, %c3_i32 : i32
    %22 = arith.extui %21 : i1 to i32
    %c0_i32_13 = arith.constant 0 : i32
    %23 = arith.cmpi ne, %22, %c0_i32_13 : i32
    scf.if %23 {
      %c0_14 = arith.constant 0 : index
      %c0_15 = arith.constant 0 : index
      %24 = vector.load %arg6[%c0_14, %c0_15] : memref<64x256xf32, #tpu.memory_space<vmem>>, vector<64x256xf32>
      %c0_16 = arith.constant 0 : index
      %c0_17 = arith.constant 0 : index
      %25 = vector.load %arg5[%c0_16, %c0_17] : memref<64x256xf32, #tpu.memory_space<vmem>>, vector<64x256xf32>
      tpu.vector_store %arg5[%c0_16, %c0_17], %24 {strides = array<i32>} : memref<64x256xf32, #tpu.memory_space<vmem>>, vector<64x256xf32>,
    } else {
    }
    return
  }
  func.func @transform_0(%arg0: i32, %arg1: i32) -> (i32, i32) {
    %c0_i32 = arith.constant 0 : i32
    %c0_i32_0 = arith.constant 0 : i32
    return %arg0, %c0_i32 : i32, i32
  }
  func.func @transform_1(%arg0: i32, %arg1: i32) -> (i32, i32, i32) {
    %c0_i32 = arith.constant 0 : i32
    %c0_i32_0 = arith.constant 0 : i32
    %c0_i32_1 = arith.constant 0 : i32
    return %arg1, %c0_i32, %c0_i32_0 : i32, i32, i32
  }
  func.func @transform_2(%arg0: i32, %arg1: i32) -> (i32, i32) {
    %c0_i32 = arith.constant 0 : i32
    %c0_i32_0 = arith.constant 0 : i32
    return %arg1, %c0_i32 : i32, i32
  }
  func.func @transform_3(%arg0: i32, %arg1: i32) -> (i32, i32) {
    %c0_i32 = arith.constant 0 : i32
    %c0_i32_0 = arith.constant 0 : i32
    return %arg0, %c0_i32 : i32, i32
  }
}

module attributes {stable_mosaic.version = 11 : i64} {
  func.func @_llama_mlp_kernel(%arg0: i32, %arg1: i32, %arg2: memref<64x256xf32, #tpu.memory_space<vmem>>, %arg3: memref<1x256x256xf32, #tpu.memory_space<vmem>>, %arg4: memref<128x256xf32, #tpu.memory_space<vmem>>, %arg5: memref<64x256xf32, #tpu.memory_space<vmem>>, %arg6: memref<64x256xf32, #tpu.memory_space<vmem>>) attributes {dimension_semantics = [#tpu.dimension_semantics<parallel>, #tpu.dimension_semantics<arbitrary>], iteration_bounds = array<i64: 4, 4>, scalar_prefetch = 0 : i64, scratch_operands = 1 : i64, tpu.core_type = #tpu.core_type<tc>, window_params = [{transform_indices = @transform_0, window_bounds = array<i64: 64, 256>}, {transform_indices = @transform_1, window_bounds = array<i64: 1, 256, 256>}, {transform_indices = @transform_2, window_bounds = array<i64: 128, 256>}, {transform_indices = @transform_3, window_bounds = array<i64: 64, 256>}]} {
    %c0_i32 = arith.constant 0 : i32
    %0 = arith.cmpi eq, %arg1, %c0_i32 : i32
    %1 = arith.extui %0 : i1 to i32
    %c0_i32_0 = arith.constant 0 : i32
    %2 = arith.cmpi ne, %1, %c0_i32_0 : i32
    scf.if %2 {
      %cst_14 = arith.constant 0.000000e+00 : f32
      %24 = vector.broadcast %cst_14 : f32 to vector<64x256xf32>
      %c0_15 = arith.constant 0 : index
      %c0_16 = arith.constant 0 : index
      %25 = vector.load %arg6[%c0_15, %c0_16] : memref<64x256xf32, #tpu.memory_space<vmem>>, vector<64x256xf32>
      tpu.vector_store %arg6[%c0_15, %c0_16], %24 {strides = array<i32>} : memref<64x256xf32, #tpu.memory_space<vmem>>, vector<64x256xf32>,
    } else {
    }
    %c0 = arith.constant 0 : index
    %c0_1 = arith.constant 0 : index
    %3 = vector.load %arg2[%c0, %c0_1] : memref<64x256xf32, #tpu.memory_space<vmem>>, vector<64x256xf32>
    %c0_2 = arith.constant 0 : index
    %c0_3 = arith.constant 0 : index
    %c0_4 = arith.constant 0 : index
    %4 = vector.load %arg3[%c0_2, %c0_3, %c0_4] : memref<1x256x256xf32, #tpu.memory_space<vmem>>, vector<1x256x256xf32>
    %5 = vector.shape_cast %4 : vector<1x256x256xf32> to vector<256x256xf32>
    %cst = arith.constant dense<0.000000e+00> : vector<64x256xf32>
    %6 = tpu.matmul %3, %5, %cst {dimension_numbers = #tpu.dot_dimension_numbers<[1], [0], [0], [1], [0, 0, 1, 1], [], []>} : vector<64x256xf32>, vector<256x256xf32>, vector<64x256xf32> -> vector<64x256xf32>
    %7 = vector.extract_strided_slice %6 {offsets = [0, 0], sizes = [64, 128], strides = [1, 1]} : vector<64x256xf32> to vector<64x128xf32>
    %8 = vector.extract_strided_slice %6 {offsets = [0, 128], sizes = [64, 128], strides = [1, 1]} : vector<64x256xf32> to vector<64x128xf32>
    %9 = arith.negf %7 : vector<64x128xf32>
    %10 = math.exp %9 : vector<64x128xf32>
    %cst_5 = arith.constant 1.000000e+00 : f32
    %11 = vector.broadcast %cst_5 : f32 to vector<64x128xf32>
    %12 = arith.addf %11, %10 : vector<64x128xf32>
    %13 = arith.divf %11, %12 : vector<64x128xf32>
    %14 = arith.mulf %7, %13 : vector<64x128xf32>
    %15 = arith.mulf %14, %8 : vector<64x128xf32>
    %c0_6 = arith.constant 0 : index
    %c0_7 = arith.constant 0 : index
    %16 = vector.load %arg6[%c0_6, %c0_7] : memref<64x256xf32, #tpu.memory_space<vmem>>, vector<64x256xf32>
    %c0_8 = arith.constant 0 : index
    %c0_9 = arith.constant 0 : index
    %17 = vector.load %arg4[%c0_8, %c0_9] : memref<128x256xf32, #tpu.memory_space<vmem>>, vector<128x256xf32>
    %cst_10 = arith.constant dense<0.000000e+00> : vector<64x256xf32>
    %18 = tpu.matmul %15, %17, %cst_10 {dimension_numbers = #tpu.dot_dimension_numbers<[1], [0], [0], [1], [0, 0, 1, 1], [], []>} : vector<64x128xf32>, vector<128x256xf32>, vector<64x256xf32> -> vector<64x256xf32>
    %19 = arith.addf %16, %18 : vector<64x256xf32>
    %c0_11 = arith.constant 0 : index
    %c0_12 = arith.constant 0 : index
    %20 = vector.load %arg6[%c0_11, %c0_12] : memref<64x256xf32, #tpu.memory_space<vmem>>, vector<64x256xf32>
    tpu.vector_store %arg6[%c0_11, %c0_12], %19 {strides = array<i32>} : memref<64x256xf32, #tpu.memory_space<vmem>>, vector<64x256xf32>,
    %c3_i32 = arith.constant 3 : i32
    %21 = arith.cmpi eq, %arg1, %c3_i32 : i32
    %22 = arith.extui %21 : i1 to i32
    %c0_i32_13 = arith.constant 0 : i32
    %23 = arith.cmpi ne, %22, %c0_i32_13 : i32
    scf.if %23 {
      %c0_14 = arith.constant 0 : index
      %c0_15 = arith.constant 0 : index
      %24 = vector.load %arg6[%c0_14, %c0_15] : memref<64x256xf32, #tpu.memory_space<vmem>>, vector<64x256xf32>
      %c0_16 = arith.constant 0 : index
      %c0_17 = arith.constant 0 : index
      %25 = vector.load %arg5[%c0_16, %c0_17] : memref<64x256xf32, #tpu.memory_space<vmem>>, vector<64x256xf32>
      tpu.vector_store %arg5[%c0_16, %c0_17], %24 {strides = array<i32>} : memref<64x256xf32, #tpu.memory_space<vmem>>, vector<64x256xf32>,
    } else {
    }
    return
  }
  func.func @transform_0(%arg0: i32, %arg1: i32) -> (i32, i32) {
    %c0_i32 = arith.constant 0 : i32
    %c0_i32_0 = arith.constant 0 : i32
    return %arg0, %c0_i32 : i32, i32
  }
  func.func @transform_1(%arg0: i32, %arg1: i32) -> (i32, i32, i32) {
    %c0_i32 = arith.constant 0 : i32
    %c0_i32_0 = arith.constant 0 : i32
    %c0_i32_1 = arith.constant 0 : i32
    return %arg1, %c0_i32, %c0_i32_0 : i32, i32, i32
  }
  func.func @transform_2(%arg0: i32, %arg1: i32) -> (i32, i32) {
    %c0_i32 = arith.constant 0 : i32
    %c0_i32_0 = arith.constant 0 : i32
    return %arg1, %c0_i32 : i32, i32
  }
  func.func @transform_3(%arg0: i32, %arg1: i32) -> (i32, i32) {
    %c0_i32 = arith.constant 0 : i32
    %c0_i32_0 = arith.constant 0 : i32
    return %arg0, %c0_i32 : i32, i32
  }
}

</mosaic_0001>

<bundles_post_ra>
// kernel: _llama_mlp_call.1
= control target key start
LH: loop header
LB: loop body
LE: loop exit
PB: predicated region body
PF: predicated region fallthrough
CT: control target
= control target key end

     0   :  { %s1878_s0 = inlined_call_operand.hbm [shape: f32[200,256], index: 0, kind: input, shape index: {}]   ;;  %s1879_s1 = inlined_call_operand.hbm [shape: f32[4,256,256], index: 1, kind: input, shape index: {}]   ;;  %s1880_s2 = inlined_call_operand.hbm [shape: f32[512,256], index: 2, kind: input, shape index: {}]   ;;  %s1881_s3 = inlined_call_operand.hbm [shape: f32[200,256], index: 3, kind: output, shape index: {}]  }
   0x1   :  { %1890 = sst [smem:[#allocation16_spill]] %s1878_s0 }
   0x2   :  { %1891 = sst [smem:[#allocation17_spill]] %s1879_s1 }
   0x3   :  { %8 = vsyncpa [#allocation4], 0 }
   0x4   :  { %9 = vsyncpa [#allocation7], 0 }
   0x5   :  { %11 = vsyncpa [#allocation7 + $0x1], 0 }
   0x6   :  { %12 = vsyncpa [#allocation5], 0  ;;  %s1438_s12 = smov 0   ;;  %s1440_s13 = smov 0  }
   0x7   :  { %s1442_s14 = smov 0   ;;  %s1444_s15 = smov 0  }
   0x8   :  { %s1446_s16 = smov 0   ;;  %s1448_s17 = smov 0  }
   0x9   :  { %s1450_s18 = smov 0   ;;  %s1452_s19 = smov 0  }
   0xa   :  { %s1454_s20 = smov 0   ;;  %s1456_s21 = smov 0  }
   0xb   :  { %s1458_s22 = smov 0  }
   0xc LB: > { %1892 = sst [smem:[#allocation13_spill]] %s1400_s21  ;;  %s1492_s23 = sadd.s32 4294967295, %s1404_s22   ;;  %s1404_s22 = sphi %s1458_s22, %s18_s22   ;;  %s1400_s21 = sphi %s1456_s21, %s1910_s21   ;;  %s1396_s20 = sphi %s1454_s20, %s1918_s20   ;;  %s1392_s19 = sphi %s1452_s19, %s1908_s19   ;;  %s1388_s18 = sphi %s1450_s18, %s1917_s18   ;;  %s1384_s17 = sphi %s1448_s17, %s1916_s17   ;;  %s1380_s16 = sphi %s1446_s16, %s1915_s16   ;;  %s1376_s15 = sphi %s1444_s15, %s1914_s15   ;;  %s1372_s14 = sphi %s1442_s14, %s1913_s14   ;;  %s1368_s13 = sphi %s1440_s13, %s1912_s13   ;;  %s1364_s12 = sphi %s1438_s12, %s1911_s12  }
   0xd   : > { %s27_s24 = sadd.s32 1, %s1396_s20  ;;  %s30_s25 = sadd.s32 1, %s1400_s21 }
   0xe   : > { %p28_p0 = scmp.ge.s32.totalorder %s27_s24, 4  ;;  %s37_s26 = sadd.s32 1, %s1384_s17 }
   0xf   : > { %p50_p1 = scmp.ne.s32.totalorder %s1380_s16, %s1376_s15  ;;  %p51_p2 = scmp.eq.s32.totalorder %s1492_s23, 0 }
  0x10   : > { %s1920_s24 = smov (%p28_p0, %s27_s24), 0  ;;  %s1922_s25 = smov (!%p28_p0, %s30_s25), %s1400_s21 }
  0x11   : > { %1893 = sst [smem:[#allocation14_spill]] %s1920_s24  ;;  %s60_s27 = ssub.s32 %s1396_s20, %s1920_s24 }
  0x12   : > { %p32_p3 = scmp.ge.s32.totalorder %s1922_s25, 4  ;;  %p61_p4 = scmp.eq.s32.totalorder %s60_s27, 0 }
  0x13   : > { %p1506_p5 = por %p51_p2, %p50_p1  ;;  %s63_s29 = sadd.s32 1, %s1372_s14 }
  0x14   : > { %s1924_s25 = smov (%p32_p3, %s1922_s25), 0  ;;  %p70_p6 = scmp.ne.s32.totalorder %s1372_s14, %s1368_s13 }
  0x15   : > { %s1894_s28 = scalar_select %p1506_p5, 1, 0 }
  0x16   : > { %1895 = sst [smem:[#allocation15_spill]] %s1924_s25  ;;  %s34_s4 = ssub.s32 %s1400_s21, %s1924_s25 }
  0x17   : > { %s1514_s30 = scalar_select %p61_p4, %s1372_s14, %s63_s29  }
  0x18   : > { %p35_p7 = scmp.eq.s32.totalorder %s34_s4, 0  ;;  %p71_p8 = scmp.eq.s32.totalorder %s1404_s22, 0 }
  0x19   : > { %p76_p9 = scmp.ne.s32.totalorder %s1368_s13, %s1364_s12  ;;  %p125_p10 = scmp.ne.s32.totalorder %s1384_s17, %s1380_s16 }
  0x1a   : > { %s1526_s5 = scalar_select %p35_p7, %s1384_s17, %s37_s26  }
  0x1b   : > { %p1528_p11 = por %p71_p8, %p70_p6  ;;  %p1534_p12 = por %p76_p9, %p51_p2 }
  0x1c   : > { %p126_p13 = scmp.eq.s32.totalorder %s1492_s23, 15  ;;  %p901_p0 = scmp.ge.s32.totalorder %s1404_s22, 1 }
  0x1d   : > { %s1897_s7 = scalar_select %p1534_p12, 1, 0 }
  0x1e   : > { %p139_p1 = scmp.lt.s32.totalorder %s1404_s22, 17  ;;  %p1541_p3 = por %p126_p13, %p125_p10 }
  0x20   : > { %s1898_s8 = scalar_select %p1541_p3, 1, 0 }
  0x21   : > { %p1545_p4 = pnand %p901_p0, %p139_p1 }
  0x23   : > { %s1899_s9 = scalar_select %p1545_p4, 1, 0 }
  0x24   : > { %143 = sbr.rel (%p1545_p4) target bundleno = 83 (0x53), region = 12 }
  0x2b   : > { %147 = sbr.rel (!%p1506_p5) target bundleno = 83 (0x53), region = 16  ;;  %s902_s10 = sshll.u32 (%p1506_p5), %s1392_s19, 3 }
  0x2c   : > { %s149_s11 = ssub.s32 (%p1506_p5), 25, %s902_s10 }
  0x2d   : > { %p150_p2 = scmp.lt.s32.totalorder (%p1506_p5), %s149_s11, 8 }
  0x32   : > { %s1926_s11 = smov (!%p150_p2, %s149_s11), 8 }
  0x33   : > { %s1554_s12 = sshll.u32 %s1926_s11, 8 }
  0x34   : > { %s155_s15 = ssub.s32 2048, %s1554_s12 }
  0x35   : > { %156 = vsyncadd [#allocation4], %s155_s15  ;;  %p905_p6 = scmp.ne.s32.totalorder %s1554_s12, 0  ;;  %s943_s26 = sshll.u32 %s1392_s19, 11 }
  0x36   : > { %s1900_s0 = sld [smem:[#allocation16_spill]]  ;;  %s1406_s10 = smov [#allocation3]  }
  0x37   : > { %s162_s11 = sshll.u32 %s1406_s10, 4  ;;  %s1564_s11 = int_to_ptr.vmem [resolvable:$true] %s162_s11 }
  0x3c   : > { %s1562_s4 = scalar_lea.hbm %s1900_s0, %s943_s26  ;;  %s1194_s21 = scalar_lea.hbm %s1900_s0, 6400 }
  0x3d   : > { %s1190_s15 = scalar_lea.hbm %s1562_s4, %s1554_s12  ;;  %p1195_p10 = scmp.lt.u32.totalorder %s1562_s4, %s1900_s0 }
  0x3e   : > { %p1191_p7 = scmp.ne.s32.totalorder %s1562_s4, %s1190_s15  ;;  %p1196_p13 = scmp.lt.u32.totalorder %s1194_s21, %s1190_s15 }
  0x3f   : > { %p1198_p1 = scmp.lt.u32.totalorder %s1190_s15, %s1562_s4 }
  0x40   : > { %p1192_p8 = pnand %p1191_p7, %p905_p6  ;;  %p1197_p0 = por %p1196_p13, %p1195_p10 }
  0x42   : > { %p1193_p9 = pneg %p1192_p8  ;;  %p1199_p2 = por %p1198_p1, %p1197_p0 }
  0x44   : > { %p1200_p3 = pnand %p1199_p2, %p1193_p9 }
  0x46   : > { %1203 = shalt.err (!%p1200_p3)
}
  0x47   : > { %s1204_s29 = scalar_lea.vmem %s1564_s11, %s1554_s12  ;;  %s1210_s24 = scalar_lea.vmem %s1564_s11, 2048 }
  0x48   : > { %p1205_p7 = scmp.ne.s32.totalorder %s1564_s11, %s1204_s29  ;;  %p1211_p5 = scmp.lt.s32.totalorder %s1564_s11, %s1564_s11 }
  0x49   : > { %p1212_p4 = scmp.lt.s32.totalorder %s1210_s24, %s1204_s29 }
  0x4a   : > { %p1206_p8 = pnand %p1205_p7, %p905_p6 }
  0x4b   : > { %p1213_p10 = por %p1212_p4, %p1211_p5 }
  0x4c   : > { %p1207_p12 = pneg %p1206_p8 }
  0x4e   : > { %p1214_p13 = pnand %p1213_p10, %p1207_p12 }
  0x50   : > { %1217 = shalt.err (!%p1214_p13)
}
  0x51   : > { %s1407_s21 = smov 256   ;;  %s1408_s25 = smov 16  }
  0x52   : > { %168 = dma.hbm_to_vmem [thread:$0]  (%p905_p6), %s1562_s4, %s1554_s12, %s1564_s11, [#allocation4], %s1407_s21, %s1407_s21, %s1408_s25  }
  0x53 PF: > { %p1059_p3 = scmp.lt.s32.totalorder %s1404_s22, 16  ;;  %s176_s10 = sand.u32 1, %s1404_s22  }
  0x54   : > { %s178_s15 = sand.u32 1, %s1372_s14   ;;  %s944_s26 = sshll.u32 %s1396_s20, 13 }
  0x55   : > { %s911_s27 = sshll.u32 %s178_s15, 9  ;;  %s1901_s1 = sld [smem:[#allocation17_spill]] }
  0x56   : > { %s180_s12 = scalar_lea.vmem [#allocation6], %s911_s27  ;;  %p1605_p5 = pnand %p1059_p3, %p1528_p11 }
  0x57   : > { %s187_s4 = sshll.u32 %s180_s12, 4  ;;  %s1609_s21 = sshll.u32 %s178_s15, 8  ;;  %s1601_s4 = int_to_ptr.vmem [resolvable:$true] %s187_s4 }
  0x58   : > { %s1611_s25 = scalar_lea.sflag [#allocation7], %s176_s10  ;;  %p1220_p4 = pneg %p1605_p5 }
  0x5b   : > { %s1599_s0 = scalar_lea.hbm %s1901_s1, %s944_s26  ;;  %s1223_s29 = scalar_lea.hbm %s1901_s1, 32768 }
  0x5c   : > { %s1218_s26 = scalar_lea.hbm %s1599_s0, 8192  ;;  %p1224_p11 = scmp.lt.u32.totalorder %s1599_s0, %s1901_s1 }
  0x5d   : > { %p1219_p12 = scmp.ne.s32.totalorder %s1599_s0, %s1218_s26  ;;  %p1225_p0 = scmp.lt.u32.totalorder %s1223_s29, %s1218_s26 }
  0x5e   : > { %p1227_p2 = scmp.lt.u32.totalorder %s1218_s26, %s1599_s0 }
  0x5f   : > { %p1221_p6 = pnand %p1220_p4, %p1219_p12  ;;  %p1226_p1 = por %p1225_p0, %p1224_p11 }
  0x61   : > { %p1222_p9 = pneg %p1221_p6  ;;  %p1228_p7 = por %p1227_p2, %p1226_p1 }
  0x63   : > { %p1229_p8 = pnand %p1228_p7, %p1222_p9 }
  0x65   : > { %1232 = shalt.err (!%p1229_p8)
}
  0x66   : > { %s1233_s10 = scalar_lea.vmem %s1601_s4, 8192  ;;  %s1409_s15 = smov [#allocation6]  }
  0x67   : > { %p1234_p10 = scmp.ne.s32.totalorder %s1601_s4, %s1233_s10  ;;  %s1238_s27 = sshll.u32 %s1409_s15, 4  ;;  %s1239_s27 = int_to_ptr.vmem [resolvable:$false] %s1238_s27 }
  0x68   : > { %s1240_s6 = scalar_lea.vmem %s1239_s27, 16384  ;;  %p1241_p12 = scmp.lt.s32.totalorder %s1601_s4, %s1239_s27 }
  0x69   : > { %p1236_p13 = pnand %p1234_p10, %p1220_p4  ;;  %p1242_p6 = scmp.lt.s32.totalorder %s1240_s6, %s1233_s10 }
  0x6b   : > { %p1237_p3 = pneg %p1236_p13  ;;  %p1243_p11 = por %p1242_p6, %p1241_p12 }
  0x6d   : > { %p1244_p0 = pnand %p1243_p11, %p1237_p3 }
  0x6f   : > { %1247 = shalt.err (!%p1244_p0)
}
  0x70   : > { %s1410_s26 = smov 256   ;;  %s1411_s29 = smov 16  }
  0x71   : > { %1055 = dma.hbm_to_vmem [thread:$0]  (!%p1605_p5), %s1599_s0, 8192, %s1601_s4, %s1611_s25, %s1410_s26, %s1410_s26, %s1411_s29  }
  0x72   : > { %s946_s24 = sshll.u32 %s1396_s20, 12  ;;  %s201_s12 = scalar_lea.vmem [#allocation8], %s1609_s21 }
  0x73   : > { %s209_s10 = sshll.u32 %s201_s12, 4  ;;  %s1647_s6 = scalar_lea.hbm %s1880_s2, %s946_s24  ;;  %s1649_s10 = int_to_ptr.vmem [resolvable:$true] %s209_s10 }
  0x74   : > { %s1248_s1 = scalar_lea.hbm %s1647_s6, 4096  ;;  %s1253_s21 = scalar_lea.hbm %s1880_s2, 16384 }
  0x75   : > { %p1249_p9 = scmp.ne.s32.totalorder %s1647_s6, %s1248_s1  ;;  %p1254_p7 = scmp.lt.u32.totalorder %s1647_s6, %s1880_s2 }
  0x76   : > { %p1255_p8 = scmp.lt.u32.totalorder %s1253_s21, %s1248_s1  ;;  %p1257_p13 = scmp.lt.u32.totalorder %s1248_s1, %s1647_s6 }
  0x77   : > { %p1251_p1 = pnand %p1249_p9, %p1220_p4 }
  0x78   : > { %p1256_p10 = por %p1255_p8, %p1254_p7 }
  0x79   : > { %p1252_p2 = pneg %p1251_p1 }
  0x7a   : > { %p1258_p3 = por %p1257_p13, %p1256_p10 }
  0x7c   : > { %p1259_p12 = pnand %p1258_p3, %p1252_p2 }
  0x7e   : > { %1262 = shalt.err (!%p1259_p12)
}
  0x7f   : > { %s1263_s24 = scalar_lea.vmem %s1649_s10, 4096  ;;  %s1412_s27 = smov [#allocation8]  }
  0x80   : > { %p1264_p6 = scmp.ne.s32.totalorder %s1649_s10, %s1263_s24  ;;  %s1268_s0 = sshll.u32 %s1412_s27, 4  ;;  %s1269_s0 = int_to_ptr.vmem [resolvable:$false] %s1268_s0 }
  0x81   : > { %s1270_s4 = scalar_lea.vmem %s1269_s0, 8192  ;;  %p1271_p9 = scmp.lt.s32.totalorder %s1649_s10, %s1269_s0 }
  0x82   : > { %p1266_p11 = pnand %p1264_p6, %p1220_p4  ;;  %p1272_p1 = scmp.lt.s32.totalorder %s1270_s4, %s1263_s24 }
  0x84   : > { %p1267_p0 = pneg %p1266_p11  ;;  %p1273_p7 = por %p1272_p1, %p1271_p9 }
  0x86   : > { %p1274_p8 = pnand %p1273_p7, %p1267_p0 }
  0x88   : > { %1277 = shalt.err (!%p1274_p8)
}
  0x89   : > { %1058 = dma.hbm_to_vmem [thread:$0]  (!%p1605_p5), %s1647_s6, 4096, %s1649_s10, %s1611_s25, %s1410_s26, %s1410_s26, %s1411_s29  }
  0x8a   : > { %p1903_p4 = scmp.ne.s32.totalorder %s1899_s9, 0 }
  0x8b   : > { %p1904_p2 = scmp.ne.s32.totalorder (!%p1903_p4), %s1894_s28, 0 }
  0x8c   : > { %221 = sbr.rel (%p1903_p4) target bundleno = 766 (0x2fe), region = 32 }
  0x93   : > { %1351 = dma.done.wait (%p1904_p2), [#allocation4], 2048  }
  0x94   : > { %1353 = vsyncadd (%p1904_p2), [#allocation4], 4294965248  ;;  %s227_s1 = sand.u32 1, %s1492_s23   ;;  %s229_s11 = sand.u32 1, %s1368_s13  }
  0x95   : > { %s919_s21 = sshll.u32 %s229_s11, 9  ;;  %s228_s12 = scalar_lea.sflag [#allocation7], %s227_s1 }
  0x96   : > { %s1686_s15 = scalar_lea.vmem [#allocation6], %s919_s21  ;;  %p1905_p10 = scmp.ne.s32.totalorder %s1897_s7, 0 }
  0x98   : > { %1355 = dma.done.wait (%p1905_p10), %s228_s12, 12288  }
  0x99   : > { %1357 = vsyncadd (%p1905_p10), %s228_s12, 4294955008  ;;  %s920_s9 = sshll.u32 %s229_s11, 8  ;;  %p921_p5 = scmp.ne.s32.totalorder %s1388_s18, 0 }
  0x9a   : > { %s1692_s25 = scalar_lea.vmem [#allocation8], %s920_s9  ;;  %v1413_v0 = vmov (!%p921_p5), 0.0  }
  0x9b   : > { %279 = sbr.rel (%p921_p5) target bundleno = 163 (0xa3), region = 48  ;;  %280 = vst [vmem:[#allocation2] sm:$0xff] (!%p921_p5), %v1413_v0  ;;  %281 = vst [vmem:[#allocation2 + $0x8] sm:$0xff] (!%p921_p5), %v1413_v0 }
  0x9c   : > { %282 = vst [vmem:[#allocation2 + $0x10] sm:$0xff] (!%p921_p5), %v1413_v0  ;;  %283 = vst [vmem:[#allocation2 + $0x18] sm:$0xff] (!%p921_p5), %v1413_v0 }
  0x9d   : > { %284 = vst [vmem:[#allocation2 + $0x20] sm:$0xff] (!%p921_p5), %v1413_v0  ;;  %285 = vst [vmem:[#allocation2 + $0x28] sm:$0xff] (!%p921_p5), %v1413_v0 }
  0x9e   : > { %286 = vst [vmem:[#allocation2 + $0x30] sm:$0xff] (!%p921_p5), %v1413_v0  ;;  %287 = vst [vmem:[#allocation2 + $0x38] sm:$0xff] (!%p921_p5), %v1413_v0 }
  0x9f   : > { %288 = vst [vmem:[#allocation2 + $0x40] sm:$0xff] (!%p921_p5), %v1413_v0  ;;  %289 = vst [vmem:[#allocation2 + $0x48] sm:$0xff] (!%p921_p5), %v1413_v0 }
  0xa0   : > { %290 = vst [vmem:[#allocation2 + $0x50] sm:$0xff] (!%p921_p5), %v1413_v0  ;;  %291 = vst [vmem:[#allocation2 + $0x58] sm:$0xff] (!%p921_p5), %v1413_v0 }
  0xa1   : > { %292 = vst [vmem:[#allocation2 + $0x60] sm:$0xff] (!%p921_p5), %v1413_v0  ;;  %293 = vst [vmem:[#allocation2 + $0x68] sm:$0xff] (!%p921_p5), %v1413_v0 }
  0xa2   : > { %294 = vst [vmem:[#allocation2 + $0x70] sm:$0xff] %v1413_v0  ;;  %295 = vst [vmem:[#allocation2 + $0x78] sm:$0xff] %v1413_v0 }
  0xa3 PF: > { %v313_v1 = vld [vmem:[%s1686_s15 + $0x8] sm:$0xff]  ;;  %v315_v2 = vld [vmem:[%s1686_s15 + $0x18] sm:$0xff]  ;;  %v312_v3 = vld [vmem:[%s1686_s15] sm:$0xff]  ;;  %p930_p13 = scmp.ne.s32.totalorder %s1388_s18, 3 }
  0xa4   : > { %v950_v4 = vpack.c.bf16 %v315_v2, %v313_v1  ;;  %v314_v5 = vld [vmem:[%s1686_s15 + $0x10] sm:$0xff]  ;;  %v317_v6 = vld [vmem:[%s1686_s15 + $0x28] sm:$0xff]  ;;  %v319_v7 = vld [vmem:[%s1686_s15 + $0x38] sm:$0xff] }
  0xa5   : > { %v952_v8 = vpack.c.bf16 %v314_v5, %v312_v3  ;;  %v954_v9 = vpack.c.bf16 %v319_v7, %v317_v6  ;;  %v316_v10 = vld [vmem:[%s1686_s15 + $0x20] sm:$0xff]  ;;  %v318_v11 = vld [vmem:[%s1686_s15 + $0x30] sm:$0xff]  ;;  %v321_v12 = vld [vmem:[%s1686_s15 + $0x48] sm:$0xff] }
  0xa6   : > { %951 = vmatprep.subr.bf16.mxu0 %v950_v4  ;;  %v323_v13 = vld [vmem:[%s1686_s15 + $0x58] sm:$0xff]  ;;  %v956_v14 = vpack.c.bf16 %v318_v11, %v316_v10  ;;  %v320_v16 = vld [vmem:[%s1686_s15 + $0x40] sm:$0xff]  ;;  %v322_v17 = vld [vmem:[%s1686_s15 + $0x50] sm:$0xff] }
  0xa7   : > { %953 = vmatpush1.bf16.msra.mxu0 %v952_v8  ;;  %v958_v15 = vpack.c.bf16 %v323_v13, %v321_v12  ;;  %v325_v18 = vld [vmem:[%s1686_s15 + $0x68] sm:$0xff]  ;;  %v327_v19 = vld [vmem:[%s1686_s15 + $0x78] sm:$0xff]  ;;  %v960_v20 = vpack.c.bf16 %v322_v17, %v320_v16  ;;  %v324_v22 = vld [vmem:[%s1686_s15 + $0x60] sm:$0xff] }
  0xa8   : > { %955 = vmatprep.subr.bf16.mxu0 %v954_v9  ;;  %v962_v21 = vpack.c.bf16 %v327_v19, %v325_v18  ;;  %v326_v23 = vld [vmem:[%s1686_s15 + $0x70] sm:$0xff]  ;;  %v329_v24 = vld [vmem:[%s1686_s15 + $0x88] sm:$0xff]  ;;  %v331_v25 = vld [vmem:[%s1686_s15 + $0x98] sm:$0xff] }
  0xa9   : > { %v964_v26 = vpack.c.bf16 %v326_v23, %v324_v22  ;;  %v966_v27 = vpack.c.bf16 %v331_v25, %v329_v24  ;;  %v328_v28 = vld [vmem:[%s1686_s15 + $0x80] sm:$0xff]  ;;  %v330_v29 = vld [vmem:[%s1686_s15 + $0x90] sm:$0xff]  ;;  %v333_v30 = vld [vmem:[%s1686_s15 + $0xa8] sm:$0xff] }
  0xaa   : > { %v335_v31 = vld [vmem:[%s1686_s15 + $0xb8] sm:$0xff]  ;;  %v968_v32 = vpack.c.bf16 %v330_v29, %v328_v28  ;;  %v332_v34 = vld [vmem:[%s1686_s15 + $0xa0] sm:$0xff]  ;;  %v334_v35 = vld [vmem:[%s1686_s15 + $0xb0] sm:$0xff] }
  0xab   : > { %957 = vmatpush1.bf16.msra.mxu0 %v956_v14  ;;  %v970_v33 = vpack.c.bf16 %v335_v31, %v333_v30  ;;  %v337_v36 = vld [vmem:[%s1686_s15 + $0xc8] sm:$0xff]  ;;  %v339_v37 = vld [vmem:[%s1686_s15 + $0xd8] sm:$0xff]  ;;  %v972_v38 = vpack.c.bf16 %v334_v35, %v332_v34  ;;  %v336_v40 = vld [vmem:[%s1686_s15 + $0xc0] sm:$0xff] }
  0xac   : > { %959 = vmatprep.subr.bf16.mxu0 %v958_v15  ;;  %v974_v39 = vpack.c.bf16 %v339_v37, %v337_v36  ;;  %v338_v41 = vld [vmem:[%s1686_s15 + $0xd0] sm:$0xff]  ;;  %v297_v42 = vld [vmem:[#allocation3 + $0x8] sm:$0xff]  ;;  %v343_v44 = vld [vmem:[%s1686_s15 + $0xf8] sm:$0xff] }
  0xad   : > { %v341_v43 = vld [vmem:[%s1686_s15 + $0xe8] sm:$0xff]  ;;  %440 = vmatprep.mubr.f32.mxu0 %v297_v42  ;;  %v976_v45 = vpack.c.bf16 %v338_v41, %v336_v40  ;;  %v340_v47 = vld [vmem:[%s1686_s15 + $0xe0] sm:$0xff]  ;;  %v342_v48 = vld [vmem:[%s1686_s15 + $0xf0] sm:$0xff] }
  0xae   : > { %v978_v46 = vpack.c.bf16 %v343_v44, %v341_v43  ;;  %v345_v49 = vld [vmem:[%s1686_s15 + $0x108] sm:$0xff]  ;;  %v347_v50 = vld [vmem:[%s1686_s15 + $0x118] sm:$0xff]  ;;  %v980_v53 = vpack.c.bf16 %v342_v48, %v340_v47  ;;  %v344_v56 = vld [vmem:[%s1686_s15 + $0x100] sm:$0xff] }
  0xaf   : > { %961 = vmatpush1.bf16.msra.mxu0 %v960_v20  ;;  %v570_v51 = vld [vmem:[%s1692_s25 + $0x8] sm:$0xff]  ;;  %v572_v52 = vld [vmem:[%s1692_s25 + $0x18] sm:$0xff]  ;;  %v982_v55 = vpack.c.bf16 %v347_v50, %v345_v49  ;;  %v346_v57 = vld [vmem:[%s1686_s15 + $0x110] sm:$0xff] }
  0xb0   : > { %963 = vmatprep.subr.bf16.mxu0 %v962_v21  ;;  %v1014_v54 = vpack.c.bf16 %v572_v52, %v570_v51  ;;  %v349_v58 = vld [vmem:[%s1686_s15 + $0x128] sm:$0xff]  ;;  %v351_v59 = vld [vmem:[%s1686_s15 + $0x138] sm:$0xff]  ;;  %v984_v60 = vpack.c.bf16 %v346_v57, %v344_v56  ;;  %v348_v62 = vld [vmem:[%s1686_s15 + $0x120] sm:$0xff] }
  0xb1   : > { %v986_v61 = vpack.c.bf16 %v351_v59, %v349_v58  ;;  %v350_v63 = vld [vmem:[%s1686_s15 + $0x130] sm:$0xff]  ;;  %v353_v0 = vld [vmem:[%s1686_s15 + $0x148] sm:$0xff]  ;;  %v355_v1 = vld [vmem:[%s1686_s15 + $0x158] sm:$0xff] }
  0xb2   : > { %1015 = vmatprep.subr.bf16.mxu1 %v1014_v54  ;;  %v988_v2 = vpack.c.bf16 %v350_v63, %v348_v62  ;;  %v990_v3 = vpack.c.bf16 %v355_v1, %v353_v0  ;;  %v352_v4 = vld [vmem:[%s1686_s15 + $0x140] sm:$0xff]  ;;  %v354_v5 = vld [vmem:[%s1686_s15 + $0x150] sm:$0xff]  ;;  %v357_v6 = vld [vmem:[%s1686_s15 + $0x168] sm:$0xff] }
  0xb3   : > { %965 = vmatpush1.bf16.msra.mxu0 %v964_v26  ;;  %v359_v7 = vld [vmem:[%s1686_s15 + $0x178] sm:$0xff]  ;;  %v992_v8 = vpack.c.bf16 %v354_v5, %v352_v4  ;;  %v356_v10 = vld [vmem:[%s1686_s15 + $0x160] sm:$0xff]  ;;  %v358_v11 = vld [vmem:[%s1686_s15 + $0x170] sm:$0xff] }
  0xb4   : > { %967 = vmatprep.subr.bf16.mxu0 %v966_v27  ;;  %v994_v9 = vpack.c.bf16 %v359_v7, %v357_v6  ;;  %v361_v12 = vld [vmem:[%s1686_s15 + $0x188] sm:$0xff]  ;;  %v363_v13 = vld [vmem:[%s1686_s15 + $0x198] sm:$0xff]  ;;  %v996_v14 = vpack.c.bf16 %v358_v11, %v356_v10  ;;  %v360_v16 = vld [vmem:[%s1686_s15 + $0x180] sm:$0xff] }
  0xb5   : > { %v998_v15 = vpack.c.bf16 %v363_v13, %v361_v12  ;;  %v362_v17 = vld [vmem:[%s1686_s15 + $0x190] sm:$0xff]  ;;  %v365_v18 = vld [vmem:[%s1686_s15 + $0x1a8] sm:$0xff]  ;;  %v367_v19 = vld [vmem:[%s1686_s15 + $0x1b8] sm:$0xff] }
  0xb6   : > { %v1000_v20 = vpack.c.bf16 %v362_v17, %v360_v16  ;;  %v1002_v21 = vpack.c.bf16 %v367_v19, %v365_v18  ;;  %v364_v22 = vld [vmem:[%s1686_s15 + $0x1a0] sm:$0xff]  ;;  %v366_v23 = vld [vmem:[%s1686_s15 + $0x1b0] sm:$0xff]  ;;  %v369_v24 = vld [vmem:[%s1686_s15 + $0x1c8] sm:$0xff] }
  0xb7   : > { %969 = vmatpush1.bf16.msra.mxu0 %v968_v32  ;;  %v371_v25 = vld [vmem:[%s1686_s15 + $0x1d8] sm:$0xff]  ;;  %v1004_v26 = vpack.c.bf16 %v366_v23, %v364_v22  ;;  %v368_v28 = vld [vmem:[%s1686_s15 + $0x1c0] sm:$0xff]  ;;  %v370_v29 = vld [vmem:[%s1686_s15 + $0x1d0] sm:$0xff] }
  0xb8   : > { %971 = vmatprep.subr.bf16.mxu0 %v970_v33  ;;  %v1006_v27 = vpack.c.bf16 %v371_v25, %v369_v24  ;;  %v373_v30 = vld [vmem:[%s1686_s15 + $0x1e8] sm:$0xff]  ;;  %v375_v31 = vld [vmem:[%s1686_s15 + $0x1f8] sm:$0xff]  ;;  %v1008_v32 = vpack.c.bf16 %v370_v29, %v368_v28  ;;  %v372_v34 = vld [vmem:[%s1686_s15 + $0x1e0] sm:$0xff] }
  0xb9   : > { %v1010_v33 = vpack.c.bf16 %v375_v31, %v373_v30  ;;  %v374_v35 = vld [vmem:[%s1686_s15 + $0x1f0] sm:$0xff]  ;;  %v296_v37 = vld [vmem:[#allocation3] sm:$0xff]  ;;  %v301_v40 = vld [vmem:[#allocation3 + $0x28] sm:$0xff] }
  0xba   : > { %v1012_v36 = vpack.c.bf16 %v374_v35, %v372_v34  ;;  %v300_v41 = vld [vmem:[#allocation3 + $0x20] sm:$0xff]  ;;  %v303_v42 = vld [vmem:[#allocation3 + $0x38] sm:$0xff]  ;;  %v302_v43 = vld [vmem:[#allocation3 + $0x30] sm:$0xff] }
  0xbb   : > { %973 = vmatpush1.bf16.msra.mxu0 %v972_v38  ;;  %v299_v38 = vld [vmem:[#allocation3 + $0x18] sm:$0xff]  ;;  %v305_v44 = vld [vmem:[#allocation3 + $0x48] sm:$0xff]  ;;  %v306_v47 = vld [vmem:[#allocation3 + $0x50] sm:$0xff] }
  0xbc   : > { %975 = vmatprep.subr.bf16.mxu0 %v974_v39  ;;  %v298_v39 = vld [vmem:[#allocation3 + $0x10] sm:$0xff]  ;;  %v309_v48 = vld [vmem:[#allocation3 + $0x68] sm:$0xff]  ;;  %v308_v49 = vld [vmem:[#allocation3 + $0x60] sm:$0xff] }
  0xbd   : > { %v311_v50 = vld [vmem:[#allocation3 + $0x78] sm:$0xff]  ;;  %v310_v51 = vld [vmem:[#allocation3 + $0x70] sm:$0xff]  ;;  %v569_v52 = vld [vmem:[%s1692_s25] sm:$0xff] }
  0xbe   : > { %v576_v56 = vld [vmem:[%s1692_s25 + $0x38] sm:$0xff]  ;;  %v573_v58 = vld [vmem:[%s1692_s25 + $0x20] sm:$0xff]  ;;  %v575_v59 = vld [vmem:[%s1692_s25 + $0x30] sm:$0xff] }
  0xbf   : > { %977 = vmatpush1.bf16.msra.mxu0 %v976_v45  ;;  %v304_v45 = vld [vmem:[#allocation3 + $0x40] sm:$0xff]  ;;  %v580_v62 = vld [vmem:[%s1692_s25 + $0x58] sm:$0xff]  ;;  %v579_v1 = vld [vmem:[%s1692_s25 + $0x50] sm:$0xff] }
  0xc0   : > { %979 = vmatprep.subr.bf16.mxu0 %v978_v46  ;;  %v307_v46 = vld [vmem:[#allocation3 + $0x58] sm:$0xff]  ;;  %v577_v0 = vld [vmem:[%s1692_s25 + $0x40] sm:$0xff]  ;;  %v583_v7 = vld [vmem:[%s1692_s25 + $0x70] sm:$0xff] }
  0xc1   : > { %v584_v4 = vld [vmem:[%s1692_s25 + $0x78] sm:$0xff]  ;;  %v581_v6 = vld [vmem:[%s1692_s25 + $0x60] sm:$0xff]  ;;  %v587_v13 = vld [vmem:[%s1692_s25 + $0x90] sm:$0xff] }
  0xc2   : > { %v588_v10 = vld [vmem:[%s1692_s25 + $0x98] sm:$0xff]  ;;  %v585_v12 = vld [vmem:[%s1692_s25 + $0x80] sm:$0xff]  ;;  %v591_v19 = vld [vmem:[%s1692_s25 + $0xb0] sm:$0xff] }
  0xc3   : > { %981 = vmatpush1.bf16.msra.mxu0 %v980_v53  ;;  %v571_v53 = vld [vmem:[%s1692_s25 + $0x10] sm:$0xff]  ;;  %v592_v16 = vld [vmem:[%s1692_s25 + $0xb8] sm:$0xff]  ;;  %v589_v18 = vld [vmem:[%s1692_s25 + $0xa0] sm:$0xff] }
  0xc4   : > { %983 = vmatprep.subr.bf16.mxu0 %v982_v55  ;;  %v1016_v54 = vpack.c.bf16 %v571_v53, %v569_v52  ;;  %v574_v55 = vld [vmem:[%s1692_s25 + $0x28] sm:$0xff]  ;;  %v596_v22 = vld [vmem:[%s1692_s25 + $0xd8] sm:$0xff]  ;;  %v593_v24 = vld [vmem:[%s1692_s25 + $0xc0] sm:$0xff] }
  0xc5   : > { %v1018_v57 = vpack.c.bf16 %v576_v56, %v574_v55  ;;  %v595_v25 = vld [vmem:[%s1692_s25 + $0xd0] sm:$0xff]  ;;  %v600_v28 = vld [vmem:[%s1692_s25 + $0xf8] sm:$0xff]  ;;  %v597_v30 = vld [vmem:[%s1692_s25 + $0xe0] sm:$0xff] }
  0xc6   : > { %1017 = vmatpush1.bf16.msra.mxu1 %v1016_v54  ;;  %v599_v31 = vld [vmem:[%s1692_s25 + $0xf0] sm:$0xff] }
  0xc7   : > { %985 = vmatpush1.bf16.msra.mxu0 %v984_v60  ;;  %v1020_v60 = vpack.c.bf16 %v575_v59, %v573_v58  ;;  %1019 = vmatprep.subr.bf16.mxu1 %v1018_v57 }
  0xc8   : > { %987 = vmatprep.subr.bf16.mxu0 %v986_v61  ;;  %v578_v61 = vld [vmem:[%s1692_s25 + $0x48] sm:$0xff] }
  0xc9   : > { %v1022_v63 = vpack.c.bf16 %v580_v62, %v578_v61 }
  0xca   : > { %1021 = vmatpush1.bf16.msra.mxu1 %v1020_v60 }
  0xcb   : > { %989 = vmatpush1.bf16.msra.mxu0 %v988_v2  ;;  %v1024_v2 = vpack.c.bf16 %v579_v1, %v577_v0  ;;  %1023 = vmatprep.subr.bf16.mxu1 %v1022_v63 }
  0xcc   : > { %991 = vmatprep.subr.bf16.mxu0 %v990_v3  ;;  %v582_v3 = vld [vmem:[%s1692_s25 + $0x68] sm:$0xff] }
  0xcd   : > { %v1026_v5 = vpack.c.bf16 %v584_v4, %v582_v3 }
  0xce   : > { %1025 = vmatpush1.bf16.msra.mxu1 %v1024_v2 }
  0xcf   : > { %993 = vmatpush1.bf16.msra.mxu0 %v992_v8  ;;  %v1028_v8 = vpack.c.bf16 %v583_v7, %v581_v6  ;;  %1027 = vmatprep.subr.bf16.mxu1 %v1026_v5 }
  0xd0   : > { %995 = vmatprep.subr.bf16.mxu0 %v994_v9  ;;  %v586_v9 = vld [vmem:[%s1692_s25 + $0x88] sm:$0xff] }
  0xd1   : > { %v1030_v11 = vpack.c.bf16 %v588_v10, %v586_v9 }
  0xd2   : > { %1029 = vmatpush1.bf16.msra.mxu1 %v1028_v8 }
  0xd3   : > { %997 = vmatpush1.bf16.msra.mxu0 %v996_v14  ;;  %v1032_v14 = vpack.c.bf16 %v587_v13, %v585_v12  ;;  %1031 = vmatprep.subr.bf16.mxu1 %v1030_v11 }
  0xd4   : > { %999 = vmatprep.subr.bf16.mxu0 %v998_v15  ;;  %v590_v15 = vld [vmem:[%s1692_s25 + $0xa8] sm:$0xff] }
  0xd5   : > { %v1034_v17 = vpack.c.bf16 %v592_v16, %v590_v15 }
  0xd6   : > { %1033 = vmatpush1.bf16.msra.mxu1 %v1032_v14 }
  0xd7   : > { %1001 = vmatpush1.bf16.msra.mxu0 %v1000_v20  ;;  %v1036_v20 = vpack.c.bf16 %v591_v19, %v589_v18  ;;  %1035 = vmatprep.subr.bf16.mxu1 %v1034_v17 }
  0xd8   : > { %1003 = vmatprep.subr.bf16.mxu0 %v1002_v21  ;;  %v594_v21 = vld [vmem:[%s1692_s25 + $0xc8] sm:$0xff] }
  0xd9   : > { %v1038_v23 = vpack.c.bf16 %v596_v22, %v594_v21 }
  0xda   : > { %1037 = vmatpush1.bf16.msra.mxu1 %v1036_v20 }
  0xdb   : > { %1005 = vmatpush1.bf16.msra.mxu0 %v1004_v26  ;;  %v1040_v26 = vpack.c.bf16 %v595_v25, %v593_v24  ;;  %1039 = vmatprep.subr.bf16.mxu1 %v1038_v23 }
  0xdc   : > { %1007 = vmatprep.subr.bf16.mxu0 %v1006_v27  ;;  %v598_v27 = vld [vmem:[%s1692_s25 + $0xe8] sm:$0xff] }
  0xdd   : > { %v1042_v29 = vpack.c.bf16 %v600_v28, %v598_v27 }
  0xde   : > { %1041 = vmatpush1.bf16.msra.mxu1 %v1040_v26 }
  0xdf   : > { %1009 = vmatpush1.bf16.msra.mxu0 %v1008_v32  ;;  %v1044_v32 = vpack.c.bf16 %v599_v31, %v597_v30  ;;  %1043 = vmatprep.subr.bf16.mxu1 %v1042_v29 }
  0xe0   : > { %1011 = vmatprep.subr.bf16.mxu0 %v1010_v33  ;;  %v1414_v33 = vmov 0.0  }
  0xe1   : > { %665 = vmatprep.mubr.f32.mxu1 %v1414_v33 }
  0xe2   : > { %1045 = vmatpush1.bf16.msra.mxu1 %v1044_v32 }
  0xe3   : > { %1013 = vmatpush1.bf16.msra.mxu0 %v1012_v36 }
  0xe6   : > { %441 = vmatmul.mubr.f32.vlgmr.msra.gmra.mrb[0].mxu0 %v296_v37 }
  0xe7   : > { %446 = vmatprep.mubr.f32.mxu0 %v299_v38 }
  0xea   : > { %447 = vmatmul.mubr.f32.gmra.mrb[2].mxu0 %v298_v39 }
  0xeb   : > { %452 = vmatprep.mubr.f32.mxu0 %v301_v40 }
  0xee   : > { %453 = vmatmul.mubr.f32.gmra.mrb[4].mxu0 %v300_v41 }
  0xef   : > { %458 = vmatprep.mubr.f32.mxu0 %v303_v42 }
  0xf2   : > { %459 = vmatmul.mubr.f32.gmra.mrb[6].mxu0 %v302_v43 }
  0xf3   : > { %464 = vmatprep.mubr.f32.mxu0 %v305_v44 }
  0xf6   : > { %465 = vmatmul.mubr.f32.gmra.mrb[8].mxu0 %v304_v45 }
  0xf7   : > { %470 = vmatprep.mubr.f32.mxu0 %v307_v46 }
  0xfa   : > { %471 = vmatmul.mubr.f32.gmra.mrb[10].mxu0 %v306_v47 }
  0xfb   : > { %476 = vmatprep.mubr.f32.mxu0 %v309_v48 }
  0xfe   : > { %477 = vmatmul.mubr.f32.gmra.mrb[12].mxu0 %v308_v49 }
  0xff   : > { %482 = vmatprep.mubr.f32.mxu0 %v311_v50 }
 0x102   : > { %483 = vmatmul.mubr.f32.gmra.mrb[14].mxu0 %v310_v51 }
 0x1b9   : > { %v442_v34 = vpop.f32.mrb[0].mxu0 }
 0x1ba   : > { %v922_v35 = vmul.f32 -1.442695, %v442_v34  ;;  %v444_v36 = vpop.f32.mrb[1].mxu0 }
 0x1bc   : > { %1158 = vpow2.f32 %v922_v35  ;;  %v553_v35 = vld [vmem:[#allocation2] sm:$0xff] }
 0x1bd   : > { %v448_v37 = vpop.f32.mrb[2].mxu0 }
 0x1be   : > { %v923_v38 = vmul.f32 -1.442695, %v448_v37  ;;  %v450_v39 = vpop.f32.mrb[3].mxu0 }
 0x1c0   : > { %1160 = vpow2.f32 %v923_v38 }
 0x1c1   : > { %v454_v40 = vpop.f32.mrb[4].mxu0 }
 0x1c2   : > { %v924_v41 = vmul.f32 -1.442695, %v454_v40  ;;  %v456_v42 = vpop.f32.mrb[5].mxu0 }
 0x1c4   : > { %1162 = vpow2.f32 %v924_v41  ;;  %v555_v41 = vld [vmem:[#allocation2 + $0x10] sm:$0xff] }
 0x1c5   : > { %v460_v43 = vpop.f32.mrb[6].mxu0 }
 0x1c6   : > { %v1159_v44 = vpop.eup %1158  ;;  %v925_v45 = vmul.f32 -1.442695, %v460_v43  ;;  %v462_v46 = vpop.f32.mrb[7].mxu0 }
 0x1c7   : > { %v513_v47 = vadd.f32 1.0, %v1159_v44 }
 0x1c8   : > { %1164 = vpow2.f32 %v925_v45 }
 0x1c9   : > { %1166 = vrcp.f32 %v513_v47  ;;  %v466_v48 = vpop.f32.mrb[8].mxu0  ;;  %v557_v47 = vld [vmem:[#allocation2 + $0x20] sm:$0xff] }
 0x1ca   : > { %v1161_v49 = vpop.eup %1160  ;;  %v926_v50 = vmul.f32 -1.442695, %v466_v48  ;;  %v468_v51 = vpop.f32.mrb[9].mxu0 }
 0x1cb   : > { %v514_v52 = vadd.f32 1.0, %v1161_v49 }
 0x1cc   : > { %1168 = vpow2.f32 %v926_v50 }
 0x1cd   : > { %1170 = vrcp.f32 %v514_v52  ;;  %v472_v53 = vpop.f32.mrb[10].mxu0  ;;  %v559_v52 = vld [vmem:[#allocation2 + $0x30] sm:$0xff] }
 0x1ce   : > { %v1163_v54 = vpop.eup %1162  ;;  %v927_v55 = vmul.f32 -1.442695, %v472_v53  ;;  %v474_v56 = vpop.f32.mrb[11].mxu0 }
 0x1cf   : > { %v515_v57 = vadd.f32 1.0, %v1163_v54 }
 0x1d0   : > { %1172 = vpow2.f32 %v927_v55 }
 0x1d1   : > { %1174 = vrcp.f32 %v515_v57  ;;  %v478_v58 = vpop.f32.mrb[12].mxu0 }
 0x1d2   : > { %v1165_v59 = vpop.eup %1164  ;;  %v928_v60 = vmul.f32 -1.442695, %v478_v58  ;;  %v480_v61 = vpop.f32.mrb[13].mxu0 }
 0x1d3   : > { %v1167_v62 = vpop.eup %1166  ;;  %v516_v63 = vadd.f32 1.0, %v1165_v59  ;;  %v562_v59 = vld [vmem:[#allocation2 + $0x48] sm:$0xff] }
 0x1d4   : > { %v537_v0 = vmul.f32 %v1167_v62, %v442_v34  ;;  %1176 = vpow2.f32 %v928_v60 }
 0x1d5   : > { %1178 = vrcp.f32 %v516_v63  ;;  %v484_v1 = vpop.f32.mrb[14].mxu0 }
 0x1d6   : > { %v1169_v2 = vpop.eup %1168  ;;  %v545_v3 = vmul.f32 %v537_v0, %v444_v36  ;;  %v929_v4 = vmul.f32 -1.442695, %v484_v1  ;;  %v486_v5 = vpop.f32.mrb[15].mxu0  ;;  %v554_v36 = vld [vmem:[#allocation2 + $0x8] sm:$0xff]  ;;  %v563_v0 = vld [vmem:[#allocation2 + $0x50] sm:$0xff] }
 0x1d7   : > { %v1171_v6 = vpop.eup %1170  ;;  %v517_v7 = vadd.f32 1.0, %v1169_v2 }
 0x1d8   : > { %v538_v8 = vmul.f32 %v1171_v6, %v448_v37  ;;  %1180 = vpow2.f32 %v929_v4  ;;  %666 = vmatmul.mubr.f32.vlgmr.msra.gmra.mrb[0].mxu1 %v545_v3  ;;  %v565_v6 = vld [vmem:[#allocation2 + $0x60] sm:$0xff] }
 0x1d9   : > { %1182 = vrcp.f32 %v517_v7  ;;  %671 = vmatprep.mubr.f32.mxu1 %v1414_v33  ;;  %v566_v7 = vld [vmem:[#allocation2 + $0x68] sm:$0xff] }
 0x1da   : > { %v1173_v9 = vpop.eup %1172  ;;  %v546_v10 = vmul.f32 %v538_v8, %v450_v39 }
 0x1db   : > { %v1175_v11 = vpop.eup %1174  ;;  %v518_v12 = vadd.f32 1.0, %v1173_v9 }
 0x1dc   : > { %v539_v13 = vmul.f32 %v1175_v11, %v454_v40  ;;  %672 = vmatmul.mubr.f32.gmra.mrb[2].mxu1 %v546_v10 }
 0x1dd   : > { %1184 = vrcp.f32 %v518_v12  ;;  %677 = vmatprep.mubr.f32.mxu1 %v1414_v33  ;;  %v567_v12 = vld [vmem:[#allocation2 + $0x70] sm:$0xff] }
 0x1de   : > { %v1177_v14 = vpop.eup %1176  ;;  %v547_v15 = vmul.f32 %v539_v13, %v456_v42  ;;  %v556_v42 = vld [vmem:[#allocation2 + $0x18] sm:$0xff] }
 0x1df   : > { %v1179_v16 = vpop.eup %1178  ;;  %v519_v17 = vadd.f32 1.0, %v1177_v14  ;;  %v568_v13 = vld [vmem:[#allocation2 + $0x78] sm:$0xff] }
 0x1e0   : > { %v540_v18 = vmul.f32 %v1179_v16, %v460_v43  ;;  %678 = vmatmul.mubr.f32.gmra.mrb[4].mxu1 %v547_v15 }
 0x1e1   : > { %1186 = vrcp.f32 %v519_v17  ;;  %683 = vmatprep.mubr.f32.mxu1 %v1414_v33 }
 0x1e2   : > { %v1181_v19 = vpop.eup %1180  ;;  %v548_v20 = vmul.f32 %v540_v18, %v462_v46 }
 0x1e3   : > { %v1183_v21 = vpop.eup %1182  ;;  %v520_v22 = vadd.f32 1.0, %v1181_v19 }
 0x1e4   : > { %v541_v23 = vmul.f32 %v1183_v21, %v466_v48  ;;  %684 = vmatmul.mubr.f32.gmra.mrb[6].mxu1 %v548_v20  ;;  %v558_v48 = vld [vmem:[#allocation2 + $0x28] sm:$0xff] }
 0x1e5   : > { %1188 = vrcp.f32 %v520_v22  ;;  %689 = vmatprep.mubr.f32.mxu1 %v1414_v33 }
 0x1e6   : > { %v549_v24 = vmul.f32 %v541_v23, %v468_v51 }
 0x1e7   : > { %v1185_v25 = vpop.eup %1184 }
 0x1e8   : > { %v542_v26 = vmul.f32 %v1185_v25, %v472_v53  ;;  %690 = vmatmul.mubr.f32.gmra.mrb[8].mxu1 %v549_v24  ;;  %v560_v53 = vld [vmem:[#allocation2 + $0x38] sm:$0xff] }
 0x1e9   : > { %695 = vmatprep.mubr.f32.mxu1 %v1414_v33 }
 0x1ea   : > { %v550_v27 = vmul.f32 %v542_v26, %v474_v56 }
 0x1eb   : > { %v1187_v28 = vpop.eup %1186 }
 0x1ec   : > { %v543_v29 = vmul.f32 %v1187_v28, %v478_v58  ;;  %696 = vmatmul.mubr.f32.gmra.mrb[10].mxu1 %v550_v27  ;;  %v561_v58 = vld [vmem:[#allocation2 + $0x40] sm:$0xff] }
 0x1ed   : > { %701 = vmatprep.mubr.f32.mxu1 %v1414_v33 }
 0x1ee   : > { %v551_v30 = vmul.f32 %v543_v29, %v480_v61 }
 0x1ef   : > { %v1189_v31 = vpop.eup %1188 }
 0x1f0   : > { %v544_v32 = vmul.f32 %v1189_v31, %v484_v1  ;;  %702 = vmatmul.mubr.f32.gmra.mrb[12].mxu1 %v551_v30  ;;  %v564_v1 = vld [vmem:[#allocation2 + $0x58] sm:$0xff] }
 0x1f1   : > { %707 = vmatprep.mubr.f32.mxu1 %v1414_v33 }
 0x1f2   : > { %v552_v34 = vmul.f32 %v544_v32, %v486_v5 }
 0x1f4   : > { %708 = vmatmul.mubr.f32.gmra.mrb[14].mxu1 %v552_v34 }
 0x2ab   : > { %v667_v37 = vpop.f32.mrb[0].mxu1 }
 0x2ac   : > { %v714_v38 = vadd.f32 %v667_v37, %v553_v35  ;;  %v669_v39 = vpop.f32.mrb[1].mxu1 }
 0x2ad   : > { %v715_v40 = vadd.f32 %v669_v39, %v554_v36 }
 0x2ae   : > { %730 = vst [vmem:[#allocation2] sm:$0xff] %v714_v38 }
 0x2af   : > { %731 = vst [vmem:[#allocation2 + $0x8] sm:$0xff] %v715_v40  ;;  %v673_v43 = vpop.f32.mrb[2].mxu1 }
 0x2b0   : > { %v716_v44 = vadd.f32 %v673_v43, %v555_v41  ;;  %v675_v45 = vpop.f32.mrb[3].mxu1 }
 0x2b1   : > { %v717_v46 = vadd.f32 %v675_v45, %v556_v42 }
 0x2b2   : > { %732 = vst [vmem:[#allocation2 + $0x10] sm:$0xff] %v716_v44 }
 0x2b3   : > { %733 = vst [vmem:[#allocation2 + $0x18] sm:$0xff] %v717_v46  ;;  %v679_v33 = vpop.f32.mrb[4].mxu1 }
 0x2b4   : > { %v718_v49 = vadd.f32 %v679_v33, %v557_v47  ;;  %v681_v50 = vpop.f32.mrb[5].mxu1 }
 0x2b5   : > { %v719_v51 = vadd.f32 %v681_v50, %v558_v48  ;;  %v750_v18 = vld [vmem:[#allocation2] sm:$0xff] (!%p930_p13) }
 0x2b6   : > { %734 = vst [vmem:[#allocation2 + $0x20] sm:$0xff] %v718_v49  ;;  %v751_v19 = vld [vmem:[#allocation2 + $0x8] sm:$0xff] (!%p930_p13)  ;;  %766 = vst [vmem:[#allocation9] sm:$0xff] (!%p930_p13), %v750_v18 }
 0x2b7   : > { %735 = vst [vmem:[#allocation2 + $0x28] sm:$0xff] %v719_v51  ;;  %v685_v54 = vpop.f32.mrb[6].mxu1  ;;  %767 = vst [vmem:[#allocation9 + $0x8] sm:$0xff] (!%p930_p13), %v751_v19 }
 0x2b8   : > { %v720_v55 = vadd.f32 %v685_v54, %v559_v52  ;;  %v687_v56 = vpop.f32.mrb[7].mxu1 }
 0x2b9   : > { %v721_v57 = vadd.f32 %v687_v56, %v560_v53  ;;  %v752_v20 = vld [vmem:[#allocation2 + $0x10] sm:$0xff] (!%p930_p13) }
 0x2ba   : > { %736 = vst [vmem:[#allocation2 + $0x30] sm:$0xff] %v720_v55  ;;  %768 = vst [vmem:[#allocation9 + $0x10] sm:$0xff] (!%p930_p13), %v752_v20  ;;  %v753_v21 = vld [vmem:[#allocation2 + $0x18] sm:$0xff] (!%p930_p13) }
 0x2bb   : > { %737 = vst [vmem:[#allocation2 + $0x38] sm:$0xff] %v721_v57  ;;  %v691_v60 = vpop.f32.mrb[8].mxu1  ;;  %769 = vst [vmem:[#allocation9 + $0x18] sm:$0xff] (!%p930_p13), %v753_v21 }
 0x2bc   : > { %v722_v61 = vadd.f32 %v691_v60, %v561_v58  ;;  %v693_v62 = vpop.f32.mrb[9].mxu1 }
 0x2bd   : > { %v723_v63 = vadd.f32 %v693_v62, %v562_v59  ;;  %v754_v22 = vld [vmem:[#allocation2 + $0x20] sm:$0xff] (!%p930_p13) }
 0x2be   : > { %738 = vst [vmem:[#allocation2 + $0x40] sm:$0xff] %v722_v61  ;;  %v755_v23 = vld [vmem:[#allocation2 + $0x28] sm:$0xff] (!%p930_p13)  ;;  %770 = vst [vmem:[#allocation9 + $0x20] sm:$0xff] (!%p930_p13), %v754_v22 }
 0x2bf   : > { %739 = vst [vmem:[#allocation2 + $0x48] sm:$0xff] %v723_v63  ;;  %v697_v2 = vpop.f32.mrb[10].mxu1  ;;  %771 = vst [vmem:[#allocation9 + $0x28] sm:$0xff] (!%p930_p13), %v755_v23 }
 0x2c0   : > { %v724_v3 = vadd.f32 %v697_v2, %v563_v0  ;;  %v699_v4 = vpop.f32.mrb[11].mxu1 }
 0x2c1   : > { %v725_v5 = vadd.f32 %v699_v4, %v564_v1  ;;  %v756_v24 = vld [vmem:[#allocation2 + $0x30] sm:$0xff] (!%p930_p13) }
 0x2c2   : > { %740 = vst [vmem:[#allocation2 + $0x50] sm:$0xff] %v724_v3  ;;  %v757_v25 = vld [vmem:[#allocation2 + $0x38] sm:$0xff] (!%p930_p13)  ;;  %772 = vst [vmem:[#allocation9 + $0x30] sm:$0xff] (!%p930_p13), %v756_v24 }
 0x2c3   : > { %741 = vst [vmem:[#allocation2 + $0x58] sm:$0xff] %v725_v5  ;;  %v703_v8 = vpop.f32.mrb[12].mxu1  ;;  %773 = vst [vmem:[#allocation9 + $0x38] sm:$0xff] (!%p930_p13), %v757_v25 }
 0x2c4   : > { %v726_v9 = vadd.f32 %v703_v8, %v565_v6  ;;  %v705_v10 = vpop.f32.mrb[13].mxu1 }
 0x2c5   : > { %v727_v11 = vadd.f32 %v705_v10, %v566_v7  ;;  %749 = sbr.rel (%p930_p13) target bundleno = 724 (0x2d4), region = 52  ;;  %v758_v26 = vld [vmem:[#allocation2 + $0x40] sm:$0xff] (!%p930_p13) }
 0x2c6   : > { %742 = vst [vmem:[#allocation2 + $0x60] sm:$0xff] %v726_v9  ;;  %774 = vst [vmem:[#allocation9 + $0x40] sm:$0xff] (!%p930_p13), %v758_v26  ;;  %v759_v27 = vld [vmem:[#allocation2 + $0x48] sm:$0xff] (!%p930_p13) }
 0x2c7   : > { %743 = vst [vmem:[#allocation2 + $0x68] sm:$0xff] %v727_v11  ;;  %v709_v14 = vpop.f32.mrb[14].mxu1  ;;  %775 = vst [vmem:[#allocation9 + $0x48] sm:$0xff] (!%p930_p13), %v759_v27 }
 0x2c8   : > { %v728_v15 = vadd.f32 %v709_v14, %v567_v12  ;;  %v711_v16 = vpop.f32.mrb[15].mxu1 }
 0x2c9   : > { %v729_v17 = vadd.f32 %v711_v16, %v568_v13  ;;  %v760_v28 = vld [vmem:[#allocation2 + $0x50] sm:$0xff] (!%p930_p13) }
 0x2ca   : > { %744 = vst [vmem:[#allocation2 + $0x70] sm:$0xff] %v728_v15  ;;  %v761_v29 = vld [vmem:[#allocation2 + $0x58] sm:$0xff] (!%p930_p13)  ;;  %776 = vst [vmem:[#allocation9 + $0x50] sm:$0xff] (!%p930_p13), %v760_v28 }
 0x2cb   : > { %745 = vst [vmem:[#allocation2 + $0x78] sm:$0xff] %v729_v17  ;;  %777 = vst [vmem:[#allocation9 + $0x58] sm:$0xff] (!%p930_p13), %v761_v29 }
 0x2cd   : > { %v762_v30 = vld [vmem:[#allocation2 + $0x60] sm:$0xff] }
 0x2ce   : > { %v763_v31 = vld [vmem:[#allocation2 + $0x68] sm:$0xff]  ;;  %778 = vst [vmem:[#allocation9 + $0x60] sm:$0xff] %v762_v30 }
 0x2cf   : > { %779 = vst [vmem:[#allocation9 + $0x68] sm:$0xff] %v763_v31 }
 0x2d1   : > { %v764_v32 = vld [vmem:[#allocation2 + $0x70] sm:$0xff] }
 0x2d2   : > { %780 = vst [vmem:[#allocation9 + $0x70] sm:$0xff] %v764_v32  ;;  %v765_v34 = vld [vmem:[#allocation2 + $0x78] sm:$0xff] }
 0x2d3   : > { %781 = vst [vmem:[#allocation9 + $0x78] sm:$0xff] %v765_v34 }
 0x2d4 PF: > { %p1906_p3 = scmp.ne.s32.totalorder %s1898_s8, 0 }
 0x2d5   : > { %s931_s18 = sshll.u32 (%p1906_p3), %s1392_s19, 3 }
 0x2d6   : > { %784 = sbr.rel (!%p1906_p3) target bundleno = 762 (0x2fa), region = 56  ;;  %s786_s23 = ssub.s32 (%p1906_p3), 25, %s931_s18 }
 0x2d7   : > { %p787_p12 = scmp.lt.s32.totalorder (%p1906_p3), %s786_s23, 8 }
 0x2dd   : > { %s1928_s23 = smov (!%p787_p12, %s786_s23), 8 }
 0x2de   : > { %s1803_s28 = sshll.u32 %s1928_s23, 8 }
 0x2df   : > { %s792_s7 = ssub.s32 2048, %s1803_s28 }
 0x2e0   : > { %793 = vsyncadd [#allocation5], %s792_s7  ;;  %p934_p6 = scmp.ne.s32.totalorder %s1803_s28, 0  ;;  %s949_s26 = sshll.u32 %s1392_s19, 11 }
 0x2e1   : > { %s1811_s6 = scalar_lea.hbm %s1881_s3, %s949_s26  ;;  %s1415_s24 = smov [#allocation9]  }
 0x2e2   : > { %s799_s27 = sshll.u32 %s1415_s24, 4  ;;  %s1813_s27 = int_to_ptr.vmem [resolvable:$true] %s799_s27 }
 0x2e3   : > { %s1278_s0 = scalar_lea.vmem %s1813_s27, %s1803_s28  ;;  %s1284_s4 = scalar_lea.vmem %s1813_s27, 2048 }
 0x2e4   : > { %p1279_p11 = scmp.ne.s32.totalorder %s1813_s27, %s1278_s0  ;;  %p1285_p1 = scmp.lt.s32.totalorder %s1813_s27, %s1813_s27 }
 0x2e5   : > { %p1286_p7 = scmp.lt.s32.totalorder %s1284_s4, %s1278_s0 }
 0x2e6   : > { %p1280_p0 = pnand %p1279_p11, %p934_p6 }
 0x2e7   : > { %p1287_p8 = por %p1286_p7, %p1285_p1 }
 0x2e8   : > { %p1281_p9 = pneg %p1280_p0 }
 0x2ea   : > { %p1288_p4 = pnand %p1287_p8, %p1281_p9 }
 0x2ec   : > { %1291 = shalt.err (!%p1288_p4)
}
 0x2ed   : > { %s1292_s19 = scalar_lea.hbm %s1811_s6, %s1803_s28  ;;  %s1296_s21 = scalar_lea.hbm %s1881_s3, 6400 }
 0x2ee   : > { %p1293_p2 = scmp.ne.s32.totalorder %s1811_s6, %s1292_s19  ;;  %p1297_p13 = scmp.lt.u32.totalorder %s1811_s6, %s1881_s3 }
 0x2ef   : > { %p1298_p3 = scmp.lt.u32.totalorder %s1296_s21, %s1292_s19  ;;  %p1300_p11 = scmp.lt.u32.totalorder %s1292_s19, %s1811_s6 }
 0x2f0   : > { %p1294_p10 = pnand %p1293_p2, %p934_p6 }
 0x2f1   : > { %p1299_p12 = por %p1298_p3, %p1297_p13 }
 0x2f2   : > { %p1295_p5 = pneg %p1294_p10 }
 0x2f3   : > { %p1301_p0 = por %p1300_p11, %p1299_p12 }
 0x2f5   : > { %p1302_p9 = pnand %p1301_p0, %p1295_p5 }
 0x2f7   : > { %1305 = shalt.err (!%p1302_p9)
}
 0x2f8   : > { %s1416_s9 = smov 256   ;;  %s1417_s25 = smov 16  }
 0x2f9   : > { %805 = dma.vmem_to_hbm [thread:$0]  (%p934_p6), %s1813_s27, %s1803_s28, %s1811_s6, [#allocation5], %s1416_s9, %s1416_s9, %s1417_s25  }
 0x2fa PF: > { %p1907_p1 = scmp.ne.s32.totalorder %s1898_s8, 0 }
 0x2fc   : > { %1359 = dma.done.wait (%p1907_p1), [#allocation5], 2048  }
 0x2fd   : > { %1361 = vsyncadd (%p1907_p1), [#allocation5], 4294965248 }
 0x2fe PF: > { %s18_s22 = sadd.s32 1, %s1404_s22   ;;  %s1908_s19 = sld [smem:[#allocation13_spill]] }
 0x2ff   : > { %p15_p7 = scmp.ge.s32.totalorder %s18_s22, 18   ;;  %s1909_s23 = sld [smem:[#allocation14_spill]] }
 0x300   : > { %s1910_s21 = sld [smem:[#allocation15_spill]]  ;;  %s1911_s12 = smov %s1368_s13 }
 0x301   : > { %s1912_s13 = smov %s1372_s14  ;;  %s1913_s14 = smov %s1514_s30 }
 0x302   : > { %s1914_s15 = smov %s1380_s16  ;;  %s1915_s16 = smov %s1384_s17 }
 0x303   : > { %s1916_s17 = smov %s1526_s5  ;;  %s1917_s18 = smov %s1396_s20 }
 0x304   :  { %17 = sbr.rel (!%p15_p7) target bundleno = 12 (0xc), region = 95 }
 0x305   : > { %s1918_s20 = smov %s1909_s23 }
 0x30b   :  { %815 = vsyncpa [#allocation4], 1 }
 0x30c   :  { %817 = vsyncpa [#allocation4 + $0x1], 1 }
 0x30d   :  { %818 = vsyncpa [#allocation7], 1 }
 0x30e   :  { %820 = vsyncpa [#allocation7 + $0x1], 1 }
 0x30f   :  { %821 = vsyncpa [#allocation5], 1 }
 0x310   :  { %823 = vsyncpa [#allocation5 + $0x1], 1 }

// kernel: _llama_mlp_call.1
= control target key start
LH: loop header
LB: loop body
LE: loop exit
PB: predicated region body
PF: predicated region fallthrough
CT: control target
= control target key end

     0   :  { %s1985_s0 = inlined_call_operand.hbm [shape: f32[200,256], index: 0, kind: input, shape index: {}]   ;;  %s1986_s1 = inlined_call_operand.hbm [shape: f32[4,256,256], index: 1, kind: input, shape index: {}]   ;;  %s1987_s2 = inlined_call_operand.hbm [shape: f32[512,256], index: 2, kind: input, shape index: {}]   ;;  %s1988_s3 = inlined_call_operand.hbm [shape: f32[200,256], index: 3, kind: output, shape index: {}]  }
   0x1   :  { %1995 = sst [smem:[#allocation19_spill]] %s1985_s0 }
   0x2   :  { %8 = vsyncpa [#allocation4], 0 }
   0x3   :  { %10 = vsyncpa [#allocation4 + $0x1], 0 }
   0x4   :  { %11 = vsyncpa [#allocation7], 0 }
   0x5   :  { %13 = vsyncpa [#allocation7 + $0x1], 0 }
   0x6   :  { %14 = vsyncpa [#allocation5], 0 }
   0x7   :  { %16 = vsyncpa [#allocation5 + $0x1], 0  ;;  %s1489_s12 = smov 0   ;;  %s1491_s13 = smov 0  }
   0x8   :  { %s1493_s14 = smov 0   ;;  %s1495_s15 = smov 0  }
   0x9   :  { %s1497_s16 = smov 0   ;;  %s1499_s17 = smov 0  }
   0xa   :  { %s1501_s18 = smov 0   ;;  %s1503_s19 = smov 0  }
   0xb   :  { %s1505_s20 = smov 0   ;;  %s1507_s21 = smov 0  }
   0xc   :  { %s1509_s22 = smov 0  }
   0xd LB: > { %1996 = sst [smem:[#allocation13_spill]] %s1435_s17  ;;  %s1545_s23 = sadd.s32 4294967295, %s1455_s22   ;;  %s1455_s22 = sphi %s1509_s22, %s22_s22   ;;  %s1451_s21 = sphi %s1507_s21, %s2018_s21   ;;  %s1447_s20 = sphi %s1505_s20, %s2025_s20   ;;  %s1443_s19 = sphi %s1503_s19, %s2016_s19   ;;  %s1439_s18 = sphi %s1501_s18, %s2024_s18   ;;  %s1435_s17 = sphi %s1499_s17, %s2015_s17   ;;  %s1431_s16 = sphi %s1497_s16, %s2023_s16   ;;  %s1427_s15 = sphi %s1495_s15, %s2022_s15   ;;  %s1423_s14 = sphi %s1493_s14, %s2021_s14   ;;  %s1419_s13 = sphi %s1491_s13, %s2020_s13   ;;  %s1415_s12 = sphi %s1489_s12, %s2019_s12  }
   0xe   : > { %1997 = sst [smem:[#allocation14_spill]] %s1451_s21  ;;  %s956_s24 = sadd.s32 4294967294, %s1455_s22  }
   0xf   : > { %s31_s25 = sadd.s32 1, %s1447_s20  ;;  %s34_s26 = sadd.s32 1, %s1451_s21 }
  0x10   : > { %p32_p0 = scmp.ge.s32.totalorder %s31_s25, 4  ;;  %s41_s27 = sadd.s32 1, %s1435_s17 }
  0x11   : > { %p48_p1 = scmp.ne.s32.totalorder %s1435_s17, %s1431_s16  ;;  %p49_p2 = scmp.eq.s32.totalorder %s1455_s22, 0 }
  0x12   : > { %s2027_s25 = smov (%p32_p0, %s31_s25), 0  ;;  %s2029_s26 = smov (!%p32_p0, %s34_s26), %s1451_s21 }
  0x13   : > { %1998 = sst [smem:[#allocation15_spill]] %s2027_s25  ;;  %p1562_p3 = por %p49_p2, %p48_p1 }
  0x14   : > { %p1989_p4 = scmp.ne.s32.totalorder %s1431_s16, %s1427_s15  ;;  %p36_p5 = scmp.ge.s32.totalorder %s2029_s26, 4 }
  0x15   : > { %p55_p6 = scmp.eq.s32.totalorder %s1545_s23, 0  ;;  %s64_s29 = ssub.s32 %s1447_s20, %s2027_s25 }
  0x16   : > { %s67_s30 = sadd.s32 1, %s1423_s14  ;;  %s2031_s26 = smov (%p36_p5, %s2029_s26), 0 }
  0x17   : > { %2000 = sst [smem:[#allocation16_spill]] %s2031_s26  ;;  %p1579_p7 = por %p55_p6, %p1989_p4 }
  0x18   : > { %p65_p8 = scmp.eq.s32.totalorder %s64_s29, 0  ;;  %s38_s5 = ssub.s32 %s1451_s21, %s2031_s26 }
  0x19   : > { %p74_p9 = scmp.ne.s32.totalorder %s1423_s14, %s1419_s13  ;;  %p39_p10 = scmp.eq.s32.totalorder %s38_s5, 0 }
  0x1a   : > { %p80_p11 = scmp.ne.s32.totalorder %s1419_s13, %s1415_s12  ;;  %p130_p0 = scmp.eq.s32.totalorder %s1545_s23, 15 }
  0x1b   : > { %s1590_s6 = scalar_select %p65_p8, %s1423_s14, %s67_s30  }
  0x1c   : > { %s1593_s7 = scalar_select %p39_p10, %s1435_s17, %s41_s27  }
  0x1d   : > { %2002 = sst [smem:[#allocation17_spill]] %s1590_s6  ;;  %p1597_p12 = por %p74_p9, %p49_p2 }
  0x1e   : > { %2003 = sst [smem:[#allocation18_spill]] %s1593_s7  ;;  %p1603_p13 = por %p80_p11, %p55_p6 }
  0x1f   : > { %p136_p5 = scmp.eq.s32.totalorder %s956_s24, 15  ;;  %p1611_p4 = por %p130_p0, %p48_p1 }
  0x20   : > { %s2005_s9 = scalar_select %p1603_p13, 1, 0 }
  0x21   : > { %s2006_s10 = scalar_select %p1611_p4, 1, 0 }
  0x22   : > { %p2007_p8 = scmp.ne.s32.totalorder %s1431_s16, %s1427_s15  ;;  %p958_p2 = scmp.ge.s32.totalorder %s1455_s22, 16 }
  0x24   : > { %p1618_p10 = por %p136_p5, %p2007_p8  ;;  %152 = sbr.rel (%p958_p2) target bundleno = 134 (0x86), region = 16 }
  0x26   : > { %s2008_s11 = scalar_select %p1618_p10, 1, 0 }
  0x2b   : > { %155 = sbr.rel (!%p1562_p3) target bundleno = 83 (0x53), region = 20  ;;  %s156_s12 = sand.u32 (%p1562_p3), 1, %s1435_s17  }
  0x2c   : > { %s960_s24 = sshll.u32 (%p1562_p3), %s1451_s21, 3  ;;  %s959_s27 = sshll.u32 (%p1562_p3), %s156_s12, 7 }
  0x2d   : > { %s162_s29 = ssub.s32 (%p1562_p3), 25, %s960_s24  ;;  %s1630_s26 = scalar_lea.sflag (%p1562_p3), [#allocation4], %s156_s12 }
  0x2e   : > { %p163_p1 = scmp.lt.s32.totalorder (%p1562_p3), %s162_s29, 8  ;;  %s160_s25 = scalar_lea.vmem (%p1562_p3), [#allocation3], %s959_s27 }
  0x32   : > { %s2033_s29 = smov (!%p163_p1, %s162_s29), 8 }
  0x33   : > { %s1627_s30 = sshll.u32 %s2033_s29, 8 }
  0x34   : > { %s168_s5 = ssub.s32 2048, %s1627_s30 }
  0x35   : > { %169 = vsyncadd %s1630_s26, %s168_s5  ;;  %p963_p3 = scmp.ne.s32.totalorder %s1627_s30, 0  ;;  %s1003_s28 = sshll.u32 %s1451_s21, 11 }
  0x36   : > { %s2009_s0 = sld [smem:[#allocation19_spill]]  ;;  %s175_s12 = sshll.u32 %s160_s25, 4  ;;  %s1640_s12 = int_to_ptr.vmem [resolvable:$true] %s175_s12 }
  0x3c   : > { %s1638_s24 = scalar_lea.hbm %s2009_s0, %s1003_s28  ;;  %s1249_s21 = scalar_lea.hbm %s2009_s0, 6400 }
  0x3d   : > { %s1245_s27 = scalar_lea.hbm %s1638_s24, %s1627_s30  ;;  %p1250_p0 = scmp.lt.u32.totalorder %s1638_s24, %s2009_s0 }
  0x3e   : > { %p1246_p6 = scmp.ne.s32.totalorder %s1638_s24, %s1245_s27  ;;  %p1251_p5 = scmp.lt.u32.totalorder %s1249_s21, %s1245_s27 }
  0x3f   : > { %p1253_p2 = scmp.lt.u32.totalorder %s1245_s27, %s1638_s24 }
  0x40   : > { %p1247_p9 = pnand %p1246_p6, %p963_p3  ;;  %p1252_p8 = por %p1251_p5, %p1250_p0 }
  0x42   : > { %p1248_p11 = pneg %p1247_p9  ;;  %p1254_p1 = por %p1253_p2, %p1252_p8 }
  0x44   : > { %p1255_p10 = pnand %p1254_p1, %p1248_p11 }
  0x46   : > { %1258 = shalt.err (!%p1255_p10)
}
  0x47   : > { %s1259_s25 = scalar_lea.vmem %s1640_s12, %s1627_s30  ;;  %s1457_s7 = smov [#allocation3]  }
  0x48   : > { %p1260_p6 = scmp.ne.s32.totalorder %s1640_s12, %s1259_s25  ;;  %s1263_s28 = sshll.u32 %s1457_s7, 4  ;;  %s1264_s28 = int_to_ptr.vmem [resolvable:$false] %s1263_s28 }
  0x49   : > { %s1265_s6 = scalar_lea.vmem %s1264_s28, 4096  ;;  %p1266_p13 = scmp.lt.s32.totalorder %s1640_s12, %s1264_s28 }
  0x4a   : > { %p1261_p9 = pnand %p1260_p6, %p963_p3  ;;  %p1267_p0 = scmp.lt.s32.totalorder %s1265_s6, %s1259_s25 }
  0x4c   : > { %p1262_p4 = pneg %p1261_p9  ;;  %p1268_p5 = por %p1267_p0, %p1266_p13 }
  0x4e   : > { %p1269_p8 = pnand %p1268_p5, %p1262_p4 }
  0x50   : > { %1272 = shalt.err (!%p1269_p8)
}
  0x51   : > { %s1458_s21 = smov 256   ;;  %s1459_s27 = smov 16  }
  0x52   : > { %181 = dma.hbm_to_vmem [thread:$0]  (%p963_p3), %s1638_s24, %s1627_s30, %s1640_s12, %s1630_s26, %s1458_s21, %s1458_s21, %s1459_s27  }
  0x53 PF: > { %s185_s29 = sand.u32 1, %s1455_s22   ;;  %s187_s5 = sand.u32 1, %s1423_s14  }
  0x54   : > { %s968_s17 = sshll.u32 %s187_s5, 9  ;;  %s1004_s25 = sshll.u32 %s1447_s20, 13 }
  0x55   : > { %s1673_s6 = scalar_lea.hbm %s1986_s1, %s1004_s25  ;;  %s189_s0 = scalar_lea.vmem [#allocation6], %s968_s17 }
  0x56   : > { %s196_s26 = sshll.u32 %s189_s0, 4  ;;  %s1677_s30 = sshll.u32 %s187_s5, 8  ;;  %s1675_s26 = int_to_ptr.vmem [resolvable:$true] %s196_s26 }
  0x57   : > { %s1679_s24 = scalar_lea.sflag [#allocation7], %s185_s29  ;;  %s1273_s12 = scalar_lea.hbm %s1673_s6, 8192 }
  0x58   : > { %p1274_p4 = scmp.ne.s32.totalorder %s1673_s6, %s1273_s12  ;;  %s1277_s25 = scalar_lea.hbm %s1986_s1, 32768 }
  0x59   : > { %p1278_p3 = scmp.lt.u32.totalorder %s1673_s6, %s1986_s1  ;;  %p1279_p11 = scmp.lt.u32.totalorder %s1277_s25, %s1273_s12 }
  0x5a   : > { %p1275_p13 = pnand %p1274_p4, %p1597_p12  ;;  %p1281_p1 = scmp.lt.u32.totalorder %s1273_s12, %s1673_s6 }
  0x5b   : > { %p1280_p2 = por %p1279_p11, %p1278_p3 }
  0x5c   : > { %p1276_p10 = pneg %p1275_p13 }
  0x5d   : > { %p1282_p6 = por %p1281_p1, %p1280_p2 }
  0x5f   : > { %p1283_p9 = pnand %p1282_p6, %p1276_p10 }
  0x61   : > { %1286 = shalt.err (!%p1283_p9)
}
  0x62   : > { %s1287_s0 = scalar_lea.vmem %s1675_s26, 8192  ;;  %s1460_s29 = smov [#allocation6]  }
  0x63   : > { %p1288_p0 = scmp.ne.s32.totalorder %s1675_s26, %s1287_s0  ;;  %s1291_s5 = sshll.u32 %s1460_s29, 4  ;;  %s1292_s5 = int_to_ptr.vmem [resolvable:$false] %s1291_s5 }
  0x64   : > { %s1293_s17 = scalar_lea.vmem %s1292_s5, 16384  ;;  %p1294_p4 = scmp.lt.s32.totalorder %s1675_s26, %s1292_s5 }
  0x65   : > { %p1289_p5 = pnand %p1288_p0, %p1597_p12  ;;  %p1295_p13 = scmp.lt.s32.totalorder %s1293_s17, %s1287_s0 }
  0x67   : > { %p1290_p8 = pneg %p1289_p5  ;;  %p1296_p3 = por %p1295_p13, %p1294_p4 }
  0x69   : > { %p1297_p11 = pnand %p1296_p3, %p1290_p8 }
  0x6b   : > { %1300 = shalt.err (!%p1297_p11)
}
  0x6c   : > { %s1461_s12 = smov 256   ;;  %s1462_s21 = smov 16  }
  0x6d   : > { %1106 = dma.hbm_to_vmem [thread:$0]  (%p1597_p12), %s1673_s6, 8192, %s1675_s26, %s1679_s24, %s1461_s12, %s1461_s12, %s1462_s21  }
  0x6e   : > { %s1006_s27 = sshll.u32 %s1447_s20, 12  ;;  %s210_s0 = scalar_lea.vmem [#allocation8], %s1677_s30 }
  0x6f   : > { %s1710_s28 = scalar_lea.hbm %s1987_s2, %s1006_s27  ;;  %s218_s29 = sshll.u32 %s210_s0, 4  ;;  %s1713_s29 = int_to_ptr.vmem [resolvable:$true] %s218_s29 }
  0x70   : > { %s1301_s5 = scalar_lea.hbm %s1710_s28, 4096  ;;  %s1305_s17 = scalar_lea.hbm %s1987_s2, 16384 }
  0x71   : > { %p1302_p10 = scmp.ne.s32.totalorder %s1710_s28, %s1301_s5  ;;  %p1306_p6 = scmp.lt.u32.totalorder %s1710_s28, %s1987_s2 }
  0x72   : > { %p1307_p9 = scmp.lt.u32.totalorder %s1305_s17, %s1301_s5  ;;  %p1309_p5 = scmp.lt.u32.totalorder %s1301_s5, %s1710_s28 }
  0x73   : > { %p1303_p2 = pnand %p1302_p10, %p1597_p12 }
  0x74   : > { %p1308_p0 = por %p1307_p9, %p1306_p6 }
  0x75   : > { %p1304_p1 = pneg %p1303_p2 }
  0x76   : > { %p1310_p8 = por %p1309_p5, %p1308_p0 }
  0x78   : > { %p1311_p4 = pnand %p1310_p8, %p1304_p1 }
  0x7a   : > { %1314 = shalt.err (!%p1311_p4)
}
  0x7b   : > { %s1315_s30 = scalar_lea.vmem %s1713_s29, 4096  ;;  %s1463_s7 = smov [#allocation8]  }
  0x7c   : > { %p1316_p13 = scmp.ne.s32.totalorder %s1713_s29, %s1315_s30  ;;  %s1319_s0 = sshll.u32 %s1463_s7, 4  ;;  %s1320_s0 = int_to_ptr.vmem [resolvable:$false] %s1319_s0 }
  0x7d   : > { %s1321_s6 = scalar_lea.vmem %s1320_s0, 8192  ;;  %p1322_p10 = scmp.lt.s32.totalorder %s1713_s29, %s1320_s0 }
  0x7e   : > { %p1317_p3 = pnand %p1316_p13, %p1597_p12  ;;  %p1323_p2 = scmp.lt.s32.totalorder %s1321_s6, %s1315_s30 }
  0x80   : > { %p1318_p11 = pneg %p1317_p3  ;;  %p1324_p6 = por %p1323_p2, %p1322_p10 }
  0x82   : > { %p1325_p9 = pnand %p1324_p6, %p1318_p11 }
  0x84   : > { %1328 = shalt.err (!%p1325_p9)
}
  0x85   : > { %1107 = dma.hbm_to_vmem [thread:$0]  (%p1597_p12), %s1710_s28, 4096, %s1713_s29, %s1679_s24, %s1461_s12, %s1461_s12, %s1462_s21  }
  0x86 PF: > { %p975_p1 = scmp.ge.s32.totalorder %s1455_s22, 1  ;;  %p226_p0 = scmp.lt.s32.totalorder %s1455_s22, 17 }
  0x88   : > { %p227_p5 = pnand %p975_p1, %p226_p0 }
  0x89   : > { %s1743_s5 = sand.u32 (!%p227_p5), 1, %s1431_s16  }
  0x8a   : > { %230 = sbr.rel (%p227_p5) target bundleno = 760 (0x2f8), region = 32  ;;  %s976_s8 = sshll.u32 (!%p227_p5), %s1743_s5, 7 }
  0x8b   : > { %s233_s26 = scalar_lea.sflag (!%p227_p5), [#allocation4], %s1743_s5  ;;  %s1747_s17 = scalar_lea.vmem (!%p227_p5), [#allocation3], %s976_s8 }
  0x91   : > { %1402 = dma.done.wait (%p1579_p7), %s233_s26, 2048  }
  0x92   : > { %1404 = vsyncadd (%p1579_p7), %s233_s26, 4294965248  ;;  %s241_s24 = sand.u32 1, %s1545_s23   ;;  %s243_s12 = sand.u32 1, %s1419_s13  }
  0x93   : > { %s977_s21 = sshll.u32 %s243_s12, 9  ;;  %s242_s28 = scalar_lea.sflag [#allocation7], %s241_s24 }
  0x94   : > { %s1755_s29 = scalar_lea.vmem [#allocation6], %s977_s21  ;;  %p2010_p12 = scmp.ne.s32.totalorder %s2005_s9, 0 }
  0x96   : > { %1406 = dma.done.wait (%p2010_p12), %s242_s28, 12288  }
  0x97   : > { %1408 = vsyncadd (%p2010_p12), %s242_s28, 4294955008  ;;  %s978_s25 = sshll.u32 %s243_s12, 8  ;;  %s1763_s30 = scalar_lea.vmem [#allocation9], %s976_s8 }
  0x98   : > { %s1761_s27 = scalar_lea.vmem [#allocation8], %s978_s25  ;;  %p980_p7 = scmp.ne.s32.totalorder %s1439_s18, 0 }
  0x99   : > { %v1464_v0 = vmov (!%p980_p7), 0.0  }
  0x9a   : > { %303 = sbr.rel (%p980_p7) target bundleno = 162 (0xa2), region = 48  ;;  %304 = vst [vmem:[#allocation2] sm:$0xff] (!%p980_p7), %v1464_v0  ;;  %305 = vst [vmem:[#allocation2 + $0x8] sm:$0xff] (!%p980_p7), %v1464_v0 }
  0x9b   : > { %306 = vst [vmem:[#allocation2 + $0x10] sm:$0xff] (!%p980_p7), %v1464_v0  ;;  %307 = vst [vmem:[#allocation2 + $0x18] sm:$0xff] (!%p980_p7), %v1464_v0 }
  0x9c   : > { %308 = vst [vmem:[#allocation2 + $0x20] sm:$0xff] (!%p980_p7), %v1464_v0  ;;  %309 = vst [vmem:[#allocation2 + $0x28] sm:$0xff] (!%p980_p7), %v1464_v0 }
  0x9d   : > { %310 = vst [vmem:[#allocation2 + $0x30] sm:$0xff] (!%p980_p7), %v1464_v0  ;;  %311 = vst [vmem:[#allocation2 + $0x38] sm:$0xff] (!%p980_p7), %v1464_v0 }
  0x9e   : > { %312 = vst [vmem:[#allocation2 + $0x40] sm:$0xff] (!%p980_p7), %v1464_v0  ;;  %313 = vst [vmem:[#allocation2 + $0x48] sm:$0xff] (!%p980_p7), %v1464_v0 }
  0x9f   : > { %314 = vst [vmem:[#allocation2 + $0x50] sm:$0xff] (!%p980_p7), %v1464_v0  ;;  %315 = vst [vmem:[#allocation2 + $0x58] sm:$0xff] (!%p980_p7), %v1464_v0 }
  0xa0   : > { %316 = vst [vmem:[#allocation2 + $0x60] sm:$0xff] (!%p980_p7), %v1464_v0  ;;  %317 = vst [vmem:[#allocation2 + $0x68] sm:$0xff] (!%p980_p7), %v1464_v0 }
  0xa1   : > { %318 = vst [vmem:[#allocation2 + $0x70] sm:$0xff] %v1464_v0  ;;  %319 = vst [vmem:[#allocation2 + $0x78] sm:$0xff] %v1464_v0 }
  0xa2 PF: > { %v337_v1 = vld [vmem:[%s1755_s29 + $0x8] sm:$0xff]  ;;  %v339_v2 = vld [vmem:[%s1755_s29 + $0x18] sm:$0xff]  ;;  %v336_v3 = vld [vmem:[%s1755_s29] sm:$0xff]  ;;  %p989_p8 = scmp.ne.s32.totalorder %s1439_s18, 3 }
  0xa3   : > { %v1010_v4 = vpack.c.bf16 %v339_v2, %v337_v1  ;;  %v338_v5 = vld [vmem:[%s1755_s29 + $0x10] sm:$0xff]  ;;  %v341_v6 = vld [vmem:[%s1755_s29 + $0x28] sm:$0xff]  ;;  %v343_v7 = vld [vmem:[%s1755_s29 + $0x38] sm:$0xff] }
  0xa4   : > { %v1012_v8 = vpack.c.bf16 %v338_v5, %v336_v3  ;;  %v1014_v9 = vpack.c.bf16 %v343_v7, %v341_v6  ;;  %v340_v10 = vld [vmem:[%s1755_s29 + $0x20] sm:$0xff]  ;;  %v342_v11 = vld [vmem:[%s1755_s29 + $0x30] sm:$0xff]  ;;  %v345_v12 = vld [vmem:[%s1755_s29 + $0x48] sm:$0xff] }
  0xa5   : > { %1011 = vmatprep.subr.bf16.mxu0 %v1010_v4  ;;  %v347_v13 = vld [vmem:[%s1755_s29 + $0x58] sm:$0xff]  ;;  %v1016_v14 = vpack.c.bf16 %v342_v11, %v340_v10  ;;  %v344_v16 = vld [vmem:[%s1755_s29 + $0x40] sm:$0xff]  ;;  %v346_v17 = vld [vmem:[%s1755_s29 + $0x50] sm:$0xff] }
  0xa6   : > { %1013 = vmatpush1.bf16.msra.mxu0 %v1012_v8  ;;  %v1018_v15 = vpack.c.bf16 %v347_v13, %v345_v12  ;;  %v349_v18 = vld [vmem:[%s1755_s29 + $0x68] sm:$0xff]  ;;  %v351_v19 = vld [vmem:[%s1755_s29 + $0x78] sm:$0xff]  ;;  %v1020_v20 = vpack.c.bf16 %v346_v17, %v344_v16  ;;  %v348_v22 = vld [vmem:[%s1755_s29 + $0x60] sm:$0xff] }
  0xa7   : > { %1015 = vmatprep.subr.bf16.mxu0 %v1014_v9  ;;  %v1022_v21 = vpack.c.bf16 %v351_v19, %v349_v18  ;;  %v350_v23 = vld [vmem:[%s1755_s29 + $0x70] sm:$0xff]  ;;  %v353_v24 = vld [vmem:[%s1755_s29 + $0x88] sm:$0xff]  ;;  %v355_v25 = vld [vmem:[%s1755_s29 + $0x98] sm:$0xff] }
  0xa8   : > { %v1024_v26 = vpack.c.bf16 %v350_v23, %v348_v22  ;;  %v1026_v27 = vpack.c.bf16 %v355_v25, %v353_v24  ;;  %v352_v28 = vld [vmem:[%s1755_s29 + $0x80] sm:$0xff]  ;;  %v354_v29 = vld [vmem:[%s1755_s29 + $0x90] sm:$0xff]  ;;  %v357_v30 = vld [vmem:[%s1755_s29 + $0xa8] sm:$0xff] }
  0xa9   : > { %v359_v31 = vld [vmem:[%s1755_s29 + $0xb8] sm:$0xff]  ;;  %v1028_v32 = vpack.c.bf16 %v354_v29, %v352_v28  ;;  %v356_v34 = vld [vmem:[%s1755_s29 + $0xa0] sm:$0xff]  ;;  %v358_v35 = vld [vmem:[%s1755_s29 + $0xb0] sm:$0xff] }
  0xaa   : > { %1017 = vmatpush1.bf16.msra.mxu0 %v1016_v14  ;;  %v1030_v33 = vpack.c.bf16 %v359_v31, %v357_v30  ;;  %v361_v36 = vld [vmem:[%s1755_s29 + $0xc8] sm:$0xff]  ;;  %v363_v37 = vld [vmem:[%s1755_s29 + $0xd8] sm:$0xff]  ;;  %v1032_v38 = vpack.c.bf16 %v358_v35, %v356_v34  ;;  %v360_v40 = vld [vmem:[%s1755_s29 + $0xc0] sm:$0xff] }
  0xab   : > { %1019 = vmatprep.subr.bf16.mxu0 %v1018_v15  ;;  %v1034_v39 = vpack.c.bf16 %v363_v37, %v361_v36  ;;  %v362_v41 = vld [vmem:[%s1755_s29 + $0xd0] sm:$0xff]  ;;  %v321_v42 = vld [vmem:[%s1747_s17 + $0x8] sm:$0xff]  ;;  %v367_v44 = vld [vmem:[%s1755_s29 + $0xf8] sm:$0xff] }
  0xac   : > { %v365_v43 = vld [vmem:[%s1755_s29 + $0xe8] sm:$0xff]  ;;  %464 = vmatprep.mubr.f32.mxu0 %v321_v42  ;;  %v1036_v45 = vpack.c.bf16 %v362_v41, %v360_v40  ;;  %v364_v47 = vld [vmem:[%s1755_s29 + $0xe0] sm:$0xff]  ;;  %v366_v48 = vld [vmem:[%s1755_s29 + $0xf0] sm:$0xff] }
  0xad   : > { %v1038_v46 = vpack.c.bf16 %v367_v44, %v365_v43  ;;  %v369_v49 = vld [vmem:[%s1755_s29 + $0x108] sm:$0xff]  ;;  %v371_v50 = vld [vmem:[%s1755_s29 + $0x118] sm:$0xff]  ;;  %v1040_v53 = vpack.c.bf16 %v366_v48, %v364_v47  ;;  %v368_v56 = vld [vmem:[%s1755_s29 + $0x100] sm:$0xff] }
  0xae   : > { %1021 = vmatpush1.bf16.msra.mxu0 %v1020_v20  ;;  %v594_v51 = vld [vmem:[%s1761_s27 + $0x8] sm:$0xff]  ;;  %v596_v52 = vld [vmem:[%s1761_s27 + $0x18] sm:$0xff]  ;;  %v1042_v55 = vpack.c.bf16 %v371_v50, %v369_v49  ;;  %v370_v57 = vld [vmem:[%s1755_s29 + $0x110] sm:$0xff] }
  0xaf   : > { %1023 = vmatprep.subr.bf16.mxu0 %v1022_v21  ;;  %v1074_v54 = vpack.c.bf16 %v596_v52, %v594_v51  ;;  %v373_v58 = vld [vmem:[%s1755_s29 + $0x128] sm:$0xff]  ;;  %v375_v59 = vld [vmem:[%s1755_s29 + $0x138] sm:$0xff]  ;;  %v1044_v60 = vpack.c.bf16 %v370_v57, %v368_v56  ;;  %v372_v62 = vld [vmem:[%s1755_s29 + $0x120] sm:$0xff] }
  0xb0   : > { %v1046_v61 = vpack.c.bf16 %v375_v59, %v373_v58  ;;  %v374_v63 = vld [vmem:[%s1755_s29 + $0x130] sm:$0xff]  ;;  %v377_v0 = vld [vmem:[%s1755_s29 + $0x148] sm:$0xff]  ;;  %v379_v1 = vld [vmem:[%s1755_s29 + $0x158] sm:$0xff] }
  0xb1   : > { %1075 = vmatprep.subr.bf16.mxu1 %v1074_v54  ;;  %v1048_v2 = vpack.c.bf16 %v374_v63, %v372_v62  ;;  %v1050_v3 = vpack.c.bf16 %v379_v1, %v377_v0  ;;  %v376_v4 = vld [vmem:[%s1755_s29 + $0x140] sm:$0xff]  ;;  %v378_v5 = vld [vmem:[%s1755_s29 + $0x150] sm:$0xff]  ;;  %v381_v6 = vld [vmem:[%s1755_s29 + $0x168] sm:$0xff] }
  0xb2   : > { %1025 = vmatpush1.bf16.msra.mxu0 %v1024_v26  ;;  %v383_v7 = vld [vmem:[%s1755_s29 + $0x178] sm:$0xff]  ;;  %v1052_v8 = vpack.c.bf16 %v378_v5, %v376_v4  ;;  %v380_v10 = vld [vmem:[%s1755_s29 + $0x160] sm:$0xff]  ;;  %v382_v11 = vld [vmem:[%s1755_s29 + $0x170] sm:$0xff] }
  0xb3   : > { %1027 = vmatprep.subr.bf16.mxu0 %v1026_v27  ;;  %v1054_v9 = vpack.c.bf16 %v383_v7, %v381_v6  ;;  %v385_v12 = vld [vmem:[%s1755_s29 + $0x188] sm:$0xff]  ;;  %v387_v13 = vld [vmem:[%s1755_s29 + $0x198] sm:$0xff]  ;;  %v1056_v14 = vpack.c.bf16 %v382_v11, %v380_v10  ;;  %v384_v16 = vld [vmem:[%s1755_s29 + $0x180] sm:$0xff] }
  0xb4   : > { %v1058_v15 = vpack.c.bf16 %v387_v13, %v385_v12  ;;  %v386_v17 = vld [vmem:[%s1755_s29 + $0x190] sm:$0xff]  ;;  %v389_v18 = vld [vmem:[%s1755_s29 + $0x1a8] sm:$0xff]  ;;  %v391_v19 = vld [vmem:[%s1755_s29 + $0x1b8] sm:$0xff] }
  0xb5   : > { %v1060_v20 = vpack.c.bf16 %v386_v17, %v384_v16  ;;  %v1062_v21 = vpack.c.bf16 %v391_v19, %v389_v18  ;;  %v388_v22 = vld [vmem:[%s1755_s29 + $0x1a0] sm:$0xff]  ;;  %v390_v23 = vld [vmem:[%s1755_s29 + $0x1b0] sm:$0xff]  ;;  %v393_v24 = vld [vmem:[%s1755_s29 + $0x1c8] sm:$0xff] }
  0xb6   : > { %1029 = vmatpush1.bf16.msra.mxu0 %v1028_v32  ;;  %v395_v25 = vld [vmem:[%s1755_s29 + $0x1d8] sm:$0xff]  ;;  %v1064_v26 = vpack.c.bf16 %v390_v23, %v388_v22  ;;  %v392_v28 = vld [vmem:[%s1755_s29 + $0x1c0] sm:$0xff]  ;;  %v394_v29 = vld [vmem:[%s1755_s29 + $0x1d0] sm:$0xff] }
  0xb7   : > { %1031 = vmatprep.subr.bf16.mxu0 %v1030_v33  ;;  %v1066_v27 = vpack.c.bf16 %v395_v25, %v393_v24  ;;  %v397_v30 = vld [vmem:[%s1755_s29 + $0x1e8] sm:$0xff]  ;;  %v399_v31 = vld [vmem:[%s1755_s29 + $0x1f8] sm:$0xff]  ;;  %v1068_v32 = vpack.c.bf16 %v394_v29, %v392_v28  ;;  %v396_v34 = vld [vmem:[%s1755_s29 + $0x1e0] sm:$0xff] }
  0xb8   : > { %v1070_v33 = vpack.c.bf16 %v399_v31, %v397_v30  ;;  %v398_v35 = vld [vmem:[%s1755_s29 + $0x1f0] sm:$0xff]  ;;  %v320_v37 = vld [vmem:[%s1747_s17] sm:$0xff]  ;;  %v325_v40 = vld [vmem:[%s1747_s17 + $0x28] sm:$0xff] }
  0xb9   : > { %v1072_v36 = vpack.c.bf16 %v398_v35, %v396_v34  ;;  %v324_v41 = vld [vmem:[%s1747_s17 + $0x20] sm:$0xff]  ;;  %v327_v42 = vld [vmem:[%s1747_s17 + $0x38] sm:$0xff]  ;;  %v326_v43 = vld [vmem:[%s1747_s17 + $0x30] sm:$0xff] }
  0xba   : > { %1033 = vmatpush1.bf16.msra.mxu0 %v1032_v38  ;;  %v323_v38 = vld [vmem:[%s1747_s17 + $0x18] sm:$0xff]  ;;  %v329_v44 = vld [vmem:[%s1747_s17 + $0x48] sm:$0xff]  ;;  %v330_v47 = vld [vmem:[%s1747_s17 + $0x50] sm:$0xff] }
  0xbb   : > { %1035 = vmatprep.subr.bf16.mxu0 %v1034_v39  ;;  %v322_v39 = vld [vmem:[%s1747_s17 + $0x10] sm:$0xff]  ;;  %v333_v48 = vld [vmem:[%s1747_s17 + $0x68] sm:$0xff]  ;;  %v332_v49 = vld [vmem:[%s1747_s17 + $0x60] sm:$0xff] }
  0xbc   : > { %v335_v50 = vld [vmem:[%s1747_s17 + $0x78] sm:$0xff]  ;;  %v334_v51 = vld [vmem:[%s1747_s17 + $0x70] sm:$0xff]  ;;  %v593_v52 = vld [vmem:[%s1761_s27] sm:$0xff] }
  0xbd   : > { %v600_v56 = vld [vmem:[%s1761_s27 + $0x38] sm:$0xff]  ;;  %v597_v58 = vld [vmem:[%s1761_s27 + $0x20] sm:$0xff]  ;;  %v599_v59 = vld [vmem:[%s1761_s27 + $0x30] sm:$0xff] }
  0xbe   : > { %1037 = vmatpush1.bf16.msra.mxu0 %v1036_v45  ;;  %v328_v45 = vld [vmem:[%s1747_s17 + $0x40] sm:$0xff]  ;;  %v604_v62 = vld [vmem:[%s1761_s27 + $0x58] sm:$0xff]  ;;  %v603_v1 = vld [vmem:[%s1761_s27 + $0x50] sm:$0xff] }
  0xbf   : > { %1039 = vmatprep.subr.bf16.mxu0 %v1038_v46  ;;  %v331_v46 = vld [vmem:[%s1747_s17 + $0x58] sm:$0xff]  ;;  %v601_v0 = vld [vmem:[%s1761_s27 + $0x40] sm:$0xff]  ;;  %v607_v7 = vld [vmem:[%s1761_s27 + $0x70] sm:$0xff] }
  0xc0   : > { %v608_v4 = vld [vmem:[%s1761_s27 + $0x78] sm:$0xff]  ;;  %v605_v6 = vld [vmem:[%s1761_s27 + $0x60] sm:$0xff]  ;;  %v611_v13 = vld [vmem:[%s1761_s27 + $0x90] sm:$0xff] }
  0xc1   : > { %v612_v10 = vld [vmem:[%s1761_s27 + $0x98] sm:$0xff]  ;;  %v609_v12 = vld [vmem:[%s1761_s27 + $0x80] sm:$0xff]  ;;  %v615_v19 = vld [vmem:[%s1761_s27 + $0xb0] sm:$0xff] }
  0xc2   : > { %1041 = vmatpush1.bf16.msra.mxu0 %v1040_v53  ;;  %v595_v53 = vld [vmem:[%s1761_s27 + $0x10] sm:$0xff]  ;;  %v616_v16 = vld [vmem:[%s1761_s27 + $0xb8] sm:$0xff]  ;;  %v613_v18 = vld [vmem:[%s1761_s27 + $0xa0] sm:$0xff] }
  0xc3   : > { %1043 = vmatprep.subr.bf16.mxu0 %v1042_v55  ;;  %v1076_v54 = vpack.c.bf16 %v595_v53, %v593_v52  ;;  %v598_v55 = vld [vmem:[%s1761_s27 + $0x28] sm:$0xff]  ;;  %v620_v22 = vld [vmem:[%s1761_s27 + $0xd8] sm:$0xff]  ;;  %v617_v24 = vld [vmem:[%s1761_s27 + $0xc0] sm:$0xff] }
  0xc4   : > { %v1078_v57 = vpack.c.bf16 %v600_v56, %v598_v55  ;;  %v619_v25 = vld [vmem:[%s1761_s27 + $0xd0] sm:$0xff]  ;;  %v624_v28 = vld [vmem:[%s1761_s27 + $0xf8] sm:$0xff]  ;;  %v621_v30 = vld [vmem:[%s1761_s27 + $0xe0] sm:$0xff] }
  0xc5   : > { %1077 = vmatpush1.bf16.msra.mxu1 %v1076_v54  ;;  %v623_v31 = vld [vmem:[%s1761_s27 + $0xf0] sm:$0xff] }
  0xc6   : > { %1045 = vmatpush1.bf16.msra.mxu0 %v1044_v60  ;;  %v1080_v60 = vpack.c.bf16 %v599_v59, %v597_v58  ;;  %1079 = vmatprep.subr.bf16.mxu1 %v1078_v57 }
  0xc7   : > { %1047 = vmatprep.subr.bf16.mxu0 %v1046_v61  ;;  %v602_v61 = vld [vmem:[%s1761_s27 + $0x48] sm:$0xff] }
  0xc8   : > { %v1082_v63 = vpack.c.bf16 %v604_v62, %v602_v61 }
  0xc9   : > { %1081 = vmatpush1.bf16.msra.mxu1 %v1080_v60 }
  0xca   : > { %1049 = vmatpush1.bf16.msra.mxu0 %v1048_v2  ;;  %v1084_v2 = vpack.c.bf16 %v603_v1, %v601_v0  ;;  %1083 = vmatprep.subr.bf16.mxu1 %v1082_v63 }
  0xcb   : > { %1051 = vmatprep.subr.bf16.mxu0 %v1050_v3  ;;  %v606_v3 = vld [vmem:[%s1761_s27 + $0x68] sm:$0xff] }
  0xcc   : > { %v1086_v5 = vpack.c.bf16 %v608_v4, %v606_v3 }
  0xcd   : > { %1085 = vmatpush1.bf16.msra.mxu1 %v1084_v2 }
  0xce   : > { %1053 = vmatpush1.bf16.msra.mxu0 %v1052_v8  ;;  %v1088_v8 = vpack.c.bf16 %v607_v7, %v605_v6  ;;  %1087 = vmatprep.subr.bf16.mxu1 %v1086_v5 }
  0xcf   : > { %1055 = vmatprep.subr.bf16.mxu0 %v1054_v9  ;;  %v610_v9 = vld [vmem:[%s1761_s27 + $0x88] sm:$0xff] }
  0xd0   : > { %v1090_v11 = vpack.c.bf16 %v612_v10, %v610_v9 }
  0xd1   : > { %1089 = vmatpush1.bf16.msra.mxu1 %v1088_v8 }
  0xd2   : > { %1057 = vmatpush1.bf16.msra.mxu0 %v1056_v14  ;;  %v1092_v14 = vpack.c.bf16 %v611_v13, %v609_v12  ;;  %1091 = vmatprep.subr.bf16.mxu1 %v1090_v11 }
  0xd3   : > { %1059 = vmatprep.subr.bf16.mxu0 %v1058_v15  ;;  %v614_v15 = vld [vmem:[%s1761_s27 + $0xa8] sm:$0xff] }
  0xd4   : > { %v1094_v17 = vpack.c.bf16 %v616_v16, %v614_v15 }
  0xd5   : > { %1093 = vmatpush1.bf16.msra.mxu1 %v1092_v14 }
  0xd6   : > { %1061 = vmatpush1.bf16.msra.mxu0 %v1060_v20  ;;  %v1096_v20 = vpack.c.bf16 %v615_v19, %v613_v18  ;;  %1095 = vmatprep.subr.bf16.mxu1 %v1094_v17 }
  0xd7   : > { %1063 = vmatprep.subr.bf16.mxu0 %v1062_v21  ;;  %v618_v21 = vld [vmem:[%s1761_s27 + $0xc8] sm:$0xff] }
  0xd8   : > { %v1098_v23 = vpack.c.bf16 %v620_v22, %v618_v21 }
  0xd9   : > { %1097 = vmatpush1.bf16.msra.mxu1 %v1096_v20 }
  0xda   : > { %1065 = vmatpush1.bf16.msra.mxu0 %v1064_v26  ;;  %v1100_v26 = vpack.c.bf16 %v619_v25, %v617_v24  ;;  %1099 = vmatprep.subr.bf16.mxu1 %v1098_v23 }
  0xdb   : > { %1067 = vmatprep.subr.bf16.mxu0 %v1066_v27  ;;  %v622_v27 = vld [vmem:[%s1761_s27 + $0xe8] sm:$0xff] }
  0xdc   : > { %v1102_v29 = vpack.c.bf16 %v624_v28, %v622_v27 }
  0xdd   : > { %1101 = vmatpush1.bf16.msra.mxu1 %v1100_v26 }
  0xde   : > { %1069 = vmatpush1.bf16.msra.mxu0 %v1068_v32  ;;  %v1104_v32 = vpack.c.bf16 %v623_v31, %v621_v30  ;;  %1103 = vmatprep.subr.bf16.mxu1 %v1102_v29 }
  0xdf   : > { %1071 = vmatprep.subr.bf16.mxu0 %v1070_v33  ;;  %v1465_v33 = vmov 0.0  }
  0xe0   : > { %689 = vmatprep.mubr.f32.mxu1 %v1465_v33 }
  0xe1   : > { %1105 = vmatpush1.bf16.msra.mxu1 %v1104_v32 }
  0xe2   : > { %1073 = vmatpush1.bf16.msra.mxu0 %v1072_v36 }
  0xe5   : > { %465 = vmatmul.mubr.f32.vlgmr.msra.gmra.mrb[0].mxu0 %v320_v37 }
  0xe6   : > { %470 = vmatprep.mubr.f32.mxu0 %v323_v38 }
  0xe9   : > { %471 = vmatmul.mubr.f32.gmra.mrb[2].mxu0 %v322_v39 }
  0xea   : > { %476 = vmatprep.mubr.f32.mxu0 %v325_v40 }
  0xed   : > { %477 = vmatmul.mubr.f32.gmra.mrb[4].mxu0 %v324_v41 }
  0xee   : > { %482 = vmatprep.mubr.f32.mxu0 %v327_v42 }
  0xf1   : > { %483 = vmatmul.mubr.f32.gmra.mrb[6].mxu0 %v326_v43 }
  0xf2   : > { %488 = vmatprep.mubr.f32.mxu0 %v329_v44 }
  0xf5   : > { %489 = vmatmul.mubr.f32.gmra.mrb[8].mxu0 %v328_v45 }
  0xf6   : > { %494 = vmatprep.mubr.f32.mxu0 %v331_v46 }
  0xf9   : > { %495 = vmatmul.mubr.f32.gmra.mrb[10].mxu0 %v330_v47 }
  0xfa   : > { %500 = vmatprep.mubr.f32.mxu0 %v333_v48 }
  0xfd   : > { %501 = vmatmul.mubr.f32.gmra.mrb[12].mxu0 %v332_v49 }
  0xfe   : > { %506 = vmatprep.mubr.f32.mxu0 %v335_v50 }
 0x101   : > { %507 = vmatmul.mubr.f32.gmra.mrb[14].mxu0 %v334_v51 }
 0x1b8   : > { %v466_v34 = vpop.f32.mrb[0].mxu0 }
 0x1b9   : > { %v981_v35 = vmul.f32 -1.442695, %v466_v34  ;;  %v468_v36 = vpop.f32.mrb[1].mxu0 }
 0x1bb   : > { %1213 = vpow2.f32 %v981_v35  ;;  %v577_v35 = vld [vmem:[#allocation2] sm:$0xff] }
 0x1bc   : > { %v472_v37 = vpop.f32.mrb[2].mxu0 }
 0x1bd   : > { %v982_v38 = vmul.f32 -1.442695, %v472_v37  ;;  %v474_v39 = vpop.f32.mrb[3].mxu0 }
 0x1bf   : > { %1215 = vpow2.f32 %v982_v38 }
 0x1c0   : > { %v478_v40 = vpop.f32.mrb[4].mxu0 }
 0x1c1   : > { %v983_v41 = vmul.f32 -1.442695, %v478_v40  ;;  %v480_v42 = vpop.f32.mrb[5].mxu0 }
 0x1c3   : > { %1217 = vpow2.f32 %v983_v41  ;;  %v579_v41 = vld [vmem:[#allocation2 + $0x10] sm:$0xff] }
 0x1c4   : > { %v484_v43 = vpop.f32.mrb[6].mxu0 }
 0x1c5   : > { %v1214_v44 = vpop.eup %1213  ;;  %v984_v45 = vmul.f32 -1.442695, %v484_v43  ;;  %v486_v46 = vpop.f32.mrb[7].mxu0 }
 0x1c6   : > { %v537_v47 = vadd.f32 1.0, %v1214_v44 }
 0x1c7   : > { %1219 = vpow2.f32 %v984_v45 }
 0x1c8   : > { %1221 = vrcp.f32 %v537_v47  ;;  %v490_v48 = vpop.f32.mrb[8].mxu0  ;;  %v581_v47 = vld [vmem:[#allocation2 + $0x20] sm:$0xff] }
 0x1c9   : > { %v1216_v49 = vpop.eup %1215  ;;  %v985_v50 = vmul.f32 -1.442695, %v490_v48  ;;  %v492_v51 = vpop.f32.mrb[9].mxu0 }
 0x1ca   : > { %v538_v52 = vadd.f32 1.0, %v1216_v49 }
 0x1cb   : > { %1223 = vpow2.f32 %v985_v50 }
 0x1cc   : > { %1225 = vrcp.f32 %v538_v52  ;;  %v496_v53 = vpop.f32.mrb[10].mxu0  ;;  %v583_v52 = vld [vmem:[#allocation2 + $0x30] sm:$0xff] }
 0x1cd   : > { %v1218_v54 = vpop.eup %1217  ;;  %v986_v55 = vmul.f32 -1.442695, %v496_v53  ;;  %v498_v56 = vpop.f32.mrb[11].mxu0 }
 0x1ce   : > { %v539_v57 = vadd.f32 1.0, %v1218_v54 }
 0x1cf   : > { %1227 = vpow2.f32 %v986_v55 }
 0x1d0   : > { %1229 = vrcp.f32 %v539_v57  ;;  %v502_v58 = vpop.f32.mrb[12].mxu0 }
 0x1d1   : > { %v1220_v59 = vpop.eup %1219  ;;  %v987_v60 = vmul.f32 -1.442695, %v502_v58  ;;  %v504_v61 = vpop.f32.mrb[13].mxu0 }
 0x1d2   : > { %v1222_v62 = vpop.eup %1221  ;;  %v540_v63 = vadd.f32 1.0, %v1220_v59  ;;  %v586_v59 = vld [vmem:[#allocation2 + $0x48] sm:$0xff] }
 0x1d3   : > { %v561_v0 = vmul.f32 %v1222_v62, %v466_v34  ;;  %1231 = vpow2.f32 %v987_v60 }
 0x1d4   : > { %1233 = vrcp.f32 %v540_v63  ;;  %v508_v1 = vpop.f32.mrb[14].mxu0 }
 0x1d5   : > { %v1224_v2 = vpop.eup %1223  ;;  %v569_v3 = vmul.f32 %v561_v0, %v468_v36  ;;  %v988_v4 = vmul.f32 -1.442695, %v508_v1  ;;  %v510_v5 = vpop.f32.mrb[15].mxu0  ;;  %v578_v36 = vld [vmem:[#allocation2 + $0x8] sm:$0xff]  ;;  %v587_v0 = vld [vmem:[#allocation2 + $0x50] sm:$0xff] }
 0x1d6   : > { %v1226_v6 = vpop.eup %1225  ;;  %v541_v7 = vadd.f32 1.0, %v1224_v2 }
 0x1d7   : > { %v562_v8 = vmul.f32 %v1226_v6, %v472_v37  ;;  %1235 = vpow2.f32 %v988_v4  ;;  %690 = vmatmul.mubr.f32.vlgmr.msra.gmra.mrb[0].mxu1 %v569_v3  ;;  %v589_v6 = vld [vmem:[#allocation2 + $0x60] sm:$0xff] }
 0x1d8   : > { %1237 = vrcp.f32 %v541_v7  ;;  %695 = vmatprep.mubr.f32.mxu1 %v1465_v33  ;;  %v590_v7 = vld [vmem:[#allocation2 + $0x68] sm:$0xff] }
 0x1d9   : > { %v1228_v9 = vpop.eup %1227  ;;  %v570_v10 = vmul.f32 %v562_v8, %v474_v39 }
 0x1da   : > { %v1230_v11 = vpop.eup %1229  ;;  %v542_v12 = vadd.f32 1.0, %v1228_v9 }
 0x1db   : > { %v563_v13 = vmul.f32 %v1230_v11, %v478_v40  ;;  %696 = vmatmul.mubr.f32.gmra.mrb[2].mxu1 %v570_v10 }
 0x1dc   : > { %1239 = vrcp.f32 %v542_v12  ;;  %701 = vmatprep.mubr.f32.mxu1 %v1465_v33  ;;  %v591_v12 = vld [vmem:[#allocation2 + $0x70] sm:$0xff] }
 0x1dd   : > { %v1232_v14 = vpop.eup %1231  ;;  %v571_v15 = vmul.f32 %v563_v13, %v480_v42  ;;  %v580_v42 = vld [vmem:[#allocation2 + $0x18] sm:$0xff] }
 0x1de   : > { %v1234_v16 = vpop.eup %1233  ;;  %v543_v17 = vadd.f32 1.0, %v1232_v14  ;;  %v592_v13 = vld [vmem:[#allocation2 + $0x78] sm:$0xff] }
 0x1df   : > { %v564_v18 = vmul.f32 %v1234_v16, %v484_v43  ;;  %702 = vmatmul.mubr.f32.gmra.mrb[4].mxu1 %v571_v15 }
 0x1e0   : > { %1241 = vrcp.f32 %v543_v17  ;;  %707 = vmatprep.mubr.f32.mxu1 %v1465_v33 }
 0x1e1   : > { %v1236_v19 = vpop.eup %1235  ;;  %v572_v20 = vmul.f32 %v564_v18, %v486_v46 }
 0x1e2   : > { %v1238_v21 = vpop.eup %1237  ;;  %v544_v22 = vadd.f32 1.0, %v1236_v19 }
 0x1e3   : > { %v565_v23 = vmul.f32 %v1238_v21, %v490_v48  ;;  %708 = vmatmul.mubr.f32.gmra.mrb[6].mxu1 %v572_v20  ;;  %v582_v48 = vld [vmem:[#allocation2 + $0x28] sm:$0xff] }
 0x1e4   : > { %1243 = vrcp.f32 %v544_v22  ;;  %713 = vmatprep.mubr.f32.mxu1 %v1465_v33 }
 0x1e5   : > { %v573_v24 = vmul.f32 %v565_v23, %v492_v51 }
 0x1e6   : > { %v1240_v25 = vpop.eup %1239 }
 0x1e7   : > { %v566_v26 = vmul.f32 %v1240_v25, %v496_v53  ;;  %714 = vmatmul.mubr.f32.gmra.mrb[8].mxu1 %v573_v24  ;;  %v584_v53 = vld [vmem:[#allocation2 + $0x38] sm:$0xff] }
 0x1e8   : > { %719 = vmatprep.mubr.f32.mxu1 %v1465_v33 }
 0x1e9   : > { %v574_v27 = vmul.f32 %v566_v26, %v498_v56 }
 0x1ea   : > { %v1242_v28 = vpop.eup %1241 }
 0x1eb   : > { %v567_v29 = vmul.f32 %v1242_v28, %v502_v58  ;;  %720 = vmatmul.mubr.f32.gmra.mrb[10].mxu1 %v574_v27  ;;  %v585_v58 = vld [vmem:[#allocation2 + $0x40] sm:$0xff] }
 0x1ec   : > { %725 = vmatprep.mubr.f32.mxu1 %v1465_v33 }
 0x1ed   : > { %v575_v30 = vmul.f32 %v567_v29, %v504_v61 }
 0x1ee   : > { %v1244_v31 = vpop.eup %1243 }
 0x1ef   : > { %v568_v32 = vmul.f32 %v1244_v31, %v508_v1  ;;  %726 = vmatmul.mubr.f32.gmra.mrb[12].mxu1 %v575_v30  ;;  %v588_v1 = vld [vmem:[#allocation2 + $0x58] sm:$0xff] }
 0x1f0   : > { %731 = vmatprep.mubr.f32.mxu1 %v1465_v33 }
 0x1f1   : > { %v576_v34 = vmul.f32 %v568_v32, %v510_v5 }
 0x1f3   : > { %732 = vmatmul.mubr.f32.gmra.mrb[14].mxu1 %v576_v34 }
 0x2aa   : > { %v691_v37 = vpop.f32.mrb[0].mxu1 }
 0x2ab   : > { %v738_v38 = vadd.f32 %v691_v37, %v577_v35  ;;  %v693_v39 = vpop.f32.mrb[1].mxu1 }
 0x2ac   : > { %v739_v40 = vadd.f32 %v693_v39, %v578_v36 }
 0x2ad   : > { %754 = vst [vmem:[#allocation2] sm:$0xff] %v738_v38 }
 0x2ae   : > { %755 = vst [vmem:[#allocation2 + $0x8] sm:$0xff] %v739_v40  ;;  %v697_v43 = vpop.f32.mrb[2].mxu1 }
 0x2af   : > { %v740_v44 = vadd.f32 %v697_v43, %v579_v41  ;;  %v699_v45 = vpop.f32.mrb[3].mxu1 }
 0x2b0   : > { %v741_v46 = vadd.f32 %v699_v45, %v580_v42 }
 0x2b1   : > { %756 = vst [vmem:[#allocation2 + $0x10] sm:$0xff] %v740_v44 }
 0x2b2   : > { %757 = vst [vmem:[#allocation2 + $0x18] sm:$0xff] %v741_v46  ;;  %v703_v33 = vpop.f32.mrb[4].mxu1 }
 0x2b3   : > { %v742_v49 = vadd.f32 %v703_v33, %v581_v47  ;;  %v705_v50 = vpop.f32.mrb[5].mxu1 }
 0x2b4   : > { %v743_v51 = vadd.f32 %v705_v50, %v582_v48  ;;  %v774_v18 = vld [vmem:[#allocation2] sm:$0xff] (!%p989_p8) }
 0x2b5   : > { %758 = vst [vmem:[#allocation2 + $0x20] sm:$0xff] %v742_v49  ;;  %v775_v19 = vld [vmem:[#allocation2 + $0x8] sm:$0xff] (!%p989_p8)  ;;  %790 = vst [vmem:[%s1763_s30] sm:$0xff] (!%p989_p8), %v774_v18 }
 0x2b6   : > { %759 = vst [vmem:[#allocation2 + $0x28] sm:$0xff] %v743_v51  ;;  %v709_v54 = vpop.f32.mrb[6].mxu1  ;;  %791 = vst [vmem:[%s1763_s30 + $0x8] sm:$0xff] (!%p989_p8), %v775_v19 }
 0x2b7   : > { %v744_v55 = vadd.f32 %v709_v54, %v583_v52  ;;  %v711_v56 = vpop.f32.mrb[7].mxu1 }
 0x2b8   : > { %v745_v57 = vadd.f32 %v711_v56, %v584_v53  ;;  %v776_v20 = vld [vmem:[#allocation2 + $0x10] sm:$0xff] (!%p989_p8) }
 0x2b9   : > { %760 = vst [vmem:[#allocation2 + $0x30] sm:$0xff] %v744_v55  ;;  %792 = vst [vmem:[%s1763_s30 + $0x10] sm:$0xff] (!%p989_p8), %v776_v20  ;;  %v777_v21 = vld [vmem:[#allocation2 + $0x18] sm:$0xff] (!%p989_p8) }
 0x2ba   : > { %761 = vst [vmem:[#allocation2 + $0x38] sm:$0xff] %v745_v57  ;;  %v715_v60 = vpop.f32.mrb[8].mxu1  ;;  %793 = vst [vmem:[%s1763_s30 + $0x18] sm:$0xff] (!%p989_p8), %v777_v21 }
 0x2bb   : > { %v746_v61 = vadd.f32 %v715_v60, %v585_v58  ;;  %v717_v62 = vpop.f32.mrb[9].mxu1 }
 0x2bc   : > { %v747_v63 = vadd.f32 %v717_v62, %v586_v59  ;;  %v778_v22 = vld [vmem:[#allocation2 + $0x20] sm:$0xff] (!%p989_p8) }
 0x2bd   : > { %762 = vst [vmem:[#allocation2 + $0x40] sm:$0xff] %v746_v61  ;;  %v779_v23 = vld [vmem:[#allocation2 + $0x28] sm:$0xff] (!%p989_p8)  ;;  %794 = vst [vmem:[%s1763_s30 + $0x20] sm:$0xff] (!%p989_p8), %v778_v22 }
 0x2be   : > { %763 = vst [vmem:[#allocation2 + $0x48] sm:$0xff] %v747_v63  ;;  %v721_v2 = vpop.f32.mrb[10].mxu1  ;;  %795 = vst [vmem:[%s1763_s30 + $0x28] sm:$0xff] (!%p989_p8), %v779_v23 }
 0x2bf   : > { %v748_v3 = vadd.f32 %v721_v2, %v587_v0  ;;  %v723_v4 = vpop.f32.mrb[11].mxu1 }
 0x2c0   : > { %v749_v5 = vadd.f32 %v723_v4, %v588_v1  ;;  %v780_v24 = vld [vmem:[#allocation2 + $0x30] sm:$0xff] (!%p989_p8) }
 0x2c1   : > { %764 = vst [vmem:[#allocation2 + $0x50] sm:$0xff] %v748_v3  ;;  %v781_v25 = vld [vmem:[#allocation2 + $0x38] sm:$0xff] (!%p989_p8)  ;;  %796 = vst [vmem:[%s1763_s30 + $0x30] sm:$0xff] (!%p989_p8), %v780_v24 }
 0x2c2   : > { %765 = vst [vmem:[#allocation2 + $0x58] sm:$0xff] %v749_v5  ;;  %v727_v8 = vpop.f32.mrb[12].mxu1  ;;  %797 = vst [vmem:[%s1763_s30 + $0x38] sm:$0xff] (!%p989_p8), %v781_v25 }
 0x2c3   : > { %v750_v9 = vadd.f32 %v727_v8, %v589_v6  ;;  %v729_v10 = vpop.f32.mrb[13].mxu1 }
 0x2c4   : > { %v751_v11 = vadd.f32 %v729_v10, %v590_v7  ;;  %773 = sbr.rel (%p989_p8) target bundleno = 723 (0x2d3), region = 52  ;;  %v782_v26 = vld [vmem:[#allocation2 + $0x40] sm:$0xff] (!%p989_p8) }
 0x2c5   : > { %766 = vst [vmem:[#allocation2 + $0x60] sm:$0xff] %v750_v9  ;;  %798 = vst [vmem:[%s1763_s30 + $0x40] sm:$0xff] (!%p989_p8), %v782_v26  ;;  %v783_v27 = vld [vmem:[#allocation2 + $0x48] sm:$0xff] (!%p989_p8) }
 0x2c6   : > { %767 = vst [vmem:[#allocation2 + $0x68] sm:$0xff] %v751_v11  ;;  %v733_v14 = vpop.f32.mrb[14].mxu1  ;;  %799 = vst [vmem:[%s1763_s30 + $0x48] sm:$0xff] (!%p989_p8), %v783_v27 }
 0x2c7   : > { %v752_v15 = vadd.f32 %v733_v14, %v591_v12  ;;  %v735_v16 = vpop.f32.mrb[15].mxu1 }
 0x2c8   : > { %v753_v17 = vadd.f32 %v735_v16, %v592_v13  ;;  %v784_v28 = vld [vmem:[#allocation2 + $0x50] sm:$0xff] (!%p989_p8) }
 0x2c9   : > { %768 = vst [vmem:[#allocation2 + $0x70] sm:$0xff] %v752_v15  ;;  %v785_v29 = vld [vmem:[#allocation2 + $0x58] sm:$0xff] (!%p989_p8)  ;;  %800 = vst [vmem:[%s1763_s30 + $0x50] sm:$0xff] (!%p989_p8), %v784_v28 }
 0x2ca   : > { %769 = vst [vmem:[#allocation2 + $0x78] sm:$0xff] %v753_v17  ;;  %801 = vst [vmem:[%s1763_s30 + $0x58] sm:$0xff] (!%p989_p8), %v785_v29 }
 0x2cc   : > { %v786_v30 = vld [vmem:[#allocation2 + $0x60] sm:$0xff] }
 0x2cd   : > { %v787_v31 = vld [vmem:[#allocation2 + $0x68] sm:$0xff]  ;;  %802 = vst [vmem:[%s1763_s30 + $0x60] sm:$0xff] %v786_v30 }
 0x2ce   : > { %803 = vst [vmem:[%s1763_s30 + $0x68] sm:$0xff] %v787_v31 }
 0x2d0   : > { %v788_v32 = vld [vmem:[#allocation2 + $0x70] sm:$0xff] }
 0x2d1   : > { %804 = vst [vmem:[%s1763_s30 + $0x70] sm:$0xff] %v788_v32  ;;  %v789_v34 = vld [vmem:[#allocation2 + $0x78] sm:$0xff] }
 0x2d2   : > { %805 = vst [vmem:[%s1763_s30 + $0x78] sm:$0xff] %v789_v34 }
 0x2d3 PF: > { %s807_s18 = scalar_lea.sflag [#allocation5], %s1743_s5  ;;  %p2011_p4 = scmp.ne.s32.totalorder %s2006_s10, 0 }
 0x2d4   : > { %s991_s23 = sshll.u32 (%p2011_p4), %s1443_s19, 3 }
 0x2d5   : > { %813 = sbr.rel (!%p2011_p4) target bundleno = 760 (0x2f8), region = 56  ;;  %s815_s4 = ssub.s32 (%p2011_p4), 25, %s991_s23 }
 0x2d6   : > { %p816_p13 = scmp.lt.s32.totalorder (%p2011_p4), %s815_s4, 8 }
 0x2dc   : > { %s2035_s4 = smov (!%p816_p13, %s815_s4), 8 }
 0x2dd   : > { %s1907_s9 = sshll.u32 %s2035_s4, 8 }
 0x2de   : > { %s821_s7 = ssub.s32 2048, %s1907_s9 }
 0x2df   : > { %822 = vsyncadd %s807_s18, %s821_s7  ;;  %p994_p3 = scmp.ne.s32.totalorder %s1907_s9, 0  ;;  %s1009_s10 = sshll.u32 %s1443_s19, 11 }
 0x2e0   : > { %s1917_s8 = scalar_lea.hbm %s1988_s3, %s1009_s10  ;;  %s828_s26 = sshll.u32 %s1763_s30, 4  ;;  %s1920_s26 = int_to_ptr.vmem [resolvable:$true] %s828_s26 }
 0x2e1   : > { %s1329_s17 = scalar_lea.vmem %s1920_s26, %s1907_s9  ;;  %s1466_s24 = smov [#allocation9]  }
 0x2e2   : > { %p1330_p11 = scmp.ne.s32.totalorder %s1920_s26, %s1329_s17  ;;  %s1333_s12 = sshll.u32 %s1466_s24, 4  ;;  %s1334_s12 = int_to_ptr.vmem [resolvable:$false] %s1333_s12 }
 0x2e3   : > { %s1335_s19 = scalar_lea.vmem %s1334_s12, 4096  ;;  %p1336_p6 = scmp.lt.s32.totalorder %s1920_s26, %s1334_s12 }
 0x2e4   : > { %p1331_p10 = pnand %p1330_p11, %p994_p3  ;;  %p1337_p9 = scmp.lt.s32.totalorder %s1335_s19, %s1329_s17 }
 0x2e6   : > { %p1332_p2 = pneg %p1331_p10  ;;  %p1338_p1 = por %p1337_p9, %p1336_p6 }
 0x2e8   : > { %p1339_p0 = pnand %p1338_p1, %p1332_p2 }
 0x2ea   : > { %1342 = shalt.err (!%p1339_p0)
}
 0x2eb   : > { %s1343_s21 = scalar_lea.hbm %s1917_s8, %s1907_s9  ;;  %s1347_s25 = scalar_lea.hbm %s1988_s3, 6400 }
 0x2ec   : > { %p1344_p5 = scmp.ne.s32.totalorder %s1917_s8, %s1343_s21  ;;  %p1348_p8 = scmp.lt.u32.totalorder %s1917_s8, %s1988_s3 }
 0x2ed   : > { %p1349_p4 = scmp.lt.u32.totalorder %s1347_s25, %s1343_s21  ;;  %p1351_p11 = scmp.lt.u32.totalorder %s1343_s21, %s1917_s8 }
 0x2ee   : > { %p1345_p12 = pnand %p1344_p5, %p994_p3 }
 0x2ef   : > { %p1350_p13 = por %p1349_p4, %p1348_p8 }
 0x2f0   : > { %p1346_p7 = pneg %p1345_p12 }
 0x2f1   : > { %p1352_p10 = por %p1351_p11, %p1350_p13 }
 0x2f3   : > { %p1353_p2 = pnand %p1352_p10, %p1346_p7 }
 0x2f5   : > { %1356 = shalt.err (!%p1353_p2)
}
 0x2f6   : > { %s1467_s23 = smov 256   ;;  %s1468_s4 = smov 16  }
 0x2f7   : > { %834 = dma.vmem_to_hbm [thread:$0]  (%p994_p3), %s1920_s26, %s1907_s9, %s1917_s8, %s807_s18, %s1467_s23, %s1467_s23, %s1468_s4  }
 0x2f8 PF: > { %p1116_p6 = scmp.ge.s32.totalorder %s1455_s22, 2  ;;  %s843_s7 = sand.u32 1, %s1427_s15  }
 0x2f9   : > { %p2012_p9 = scmp.ne.s32.totalorder %s2008_s11, 0  ;;  %s844_s10 = scalar_lea.sflag [#allocation5], %s843_s7 }
 0x2fb   : > { %p1113_p1 = pnand %p1116_p6, %p2012_p9 }
 0x2fd   : > { %1410 = dma.done.wait (!%p1113_p1), %s844_s10, 2048  }
 0x2fe   : > { %1412 = vsyncadd (!%p1113_p1), %s844_s10, 4294965248  ;;  %s22_s22 = sadd.s32 1, %s1455_s22   ;;  %s2013_s0 = sld [smem:[#allocation17_spill]] }
 0x2ff   : > { %p19_p0 = scmp.ge.s32.totalorder %s22_s22, 18   ;;  %s2014_s5 = sld [smem:[#allocation13_spill]] }
 0x300   : > { %s2015_s17 = sld [smem:[#allocation18_spill]]  ;;  %s2016_s19 = sld [smem:[#allocation14_spill]] }
 0x301   : > { %s2017_s9 = sld [smem:[#allocation15_spill]]  ;;  %s2018_s21 = sld [smem:[#allocation16_spill]] }
 0x302   : > { %s2019_s12 = smov %s1419_s13  ;;  %s2020_s13 = smov %s1423_s14 }
 0x303   : > { %s2022_s15 = smov %s1431_s16  ;;  %s2024_s18 = smov %s1447_s20 }
 0x304   : > { %s2021_s14 = smov %s2013_s0  ;;  %21 = sbr.rel (!%p19_p0) target bundleno = 13 (0xd), region = 109 }
 0x305   : > { %s2023_s16 = smov %s2014_s5 }
 0x307   : > { %s2025_s20 = smov %s2017_s9 }
 0x30b   :  { %849 = vsyncpa [#allocation4], 1 }
 0x30c   :  { %851 = vsyncpa [#allocation4 + $0x1], 1 }
 0x30d   :  { %852 = vsyncpa [#allocation7], 1 }
 0x30e   :  { %854 = vsyncpa [#allocation7 + $0x1], 1 }
 0x30f   :  { %855 = vsyncpa [#allocation5], 1 }
 0x310   :  { %857 = vsyncpa [#allocation5 + $0x1], 1 }

</bundles_post_ra>
